<compile_context>
chip_gen: v5e
topology: v5e:2x2
jax: 0.10.0
libtpu: 0.0.40
codegen_flags: <defaults>
</compile_context>

<pallas_src>
import functools

import jax
import jax.numpy as jnp
from jax import lax
from jax.experimental import pallas as pl
from jax.experimental.pallas import tpu as pltpu

DROPOUT_P = 1.0          # module-level global `dropout_p = 1`
INV_SCALE_FACTOR = 1.0   # module-level global `inv_scale_factor = 1`


def _flash_attention_kernel(q_ref, k_ref, v_ref, o_ref, m_sc, l_sc, acc_sc,
                            *, dropout_p, inv_scale, seed):
    kv = pl.program_id(2)

    @pl.when(kv == 0)
    def _init():
        m_sc[...] = jnp.full(m_sc.shape, -jnp.inf, jnp.float32)
        l_sc[...] = jnp.zeros(l_sc.shape, jnp.float32)
        acc_sc[...] = jnp.zeros(acc_sc.shape, jnp.float32)

    q = q_ref[0]                              # (tq, D) bf16
    k = k_ref[0]                              # (tk, D) bf16
    v = v_ref[0]                              # (tk, D) bf16

    # s = q @ k^T, contracting the last dims directly (no transpose materialized).
    s = lax.dot_general(q, k, (((1,), (1,)), ((), ())),
                        preferred_element_type=jnp.float32)      # (tq, tk) f32
    if inv_scale != 1.0:
        s = s * (1.0 / inv_scale)

    # Online (flash) softmax update, all in f32.
    m_prev = m_sc[...]                                           # (tq, 1)
    m_new = jnp.maximum(m_prev, jnp.max(s, axis=-1, keepdims=True))
    alpha = jnp.exp(m_prev - m_new)                              # rescale factor
    e = jnp.exp(s - m_new)                                       # (tq, tk) f32
    l_sc[...] = alpha * l_sc[...] + jnp.sum(e, axis=-1, keepdims=True)

    # Dropout applies after softmax; since the softmax denominator is a per-row
    # scalar, masking the unnormalized numerator here and dividing by the full
    # (unmasked) sum at finalize is exactly equivalent.
    ew = e
    if 0.0 < dropout_p < 1.0:
        pltpu.prng_seed(seed
                        + pl.program_id(0) * 2654435761
                        + pl.program_id(1) * 40503
                        + kv)
        bits = pltpu.bitcast(pltpu.prng_random_bits(e.shape), jnp.uint32)
        thresh = jnp.uint32(min(int(dropout_p * 4294967296.0), 4294967295))
        keep = bits >= thresh
        ew = jnp.where(keep, e * (1.0 / (1.0 - dropout_p)), 0.0)
    # dropout_p == 0.0 -> identity (dropout_p >= 1.0 never reaches the kernel).

    acc_sc[...] = alpha * acc_sc[...] + jnp.dot(
        ew.astype(jnp.bfloat16), v, preferred_element_type=jnp.float32)
    m_sc[...] = m_new

    @pl.when(kv == pl.num_programs(2) - 1)
    def _finalize():
        inv_l = pl.reciprocal(l_sc[...], approx=True)
        o_ref[0] = (acc_sc[...] * inv_l).astype(o_ref.dtype)


def attention(query, key, value, *, dropout_p=DROPOUT_P,
              inv_scale=INV_SCALE_FACTOR, seed=0, tq=256, tk=512):
    """query/key/value: [B, S, D] -> [B, S, D] (same dtype as query)."""
    B, S, D = query.shape
    assert key.shape == (B, S, D) and value.shape == (B, S, D)

    # F.dropout(x, p=1) in training mode deterministically zeroes the tensor:
    # skip the kernel entirely (the whole launch becomes a fill).
    if dropout_p >= 1.0:
        return jnp.zeros((B, S, D), query.dtype)

    tq = min(tq, S)
    tk = min(tk, S)
    assert S % tq == 0 and S % tk == 0

    # bf16 MXU operands (and half the K/V HBM traffic); softmax math stays f32.
    q = query.astype(jnp.bfloat16)
    k = key.astype(jnp.bfloat16)
    v = value.astype(jnp.bfloat16)

    kernel = functools.partial(
        _flash_attention_kernel,
        dropout_p=float(dropout_p),
        inv_scale=float(inv_scale),
        seed=int(seed),
    )

    grid = (B, S // tq, S // tk)
    return pl.pallas_call(
        kernel,
        out_shape=jax.ShapeDtypeStruct((B, S, D), query.dtype),
        grid_spec=pltpu.PrefetchScalarGridSpec(
            num_scalar_prefetch=0,
            grid=grid,
            in_specs=[
                pl.BlockSpec((1, tq, D), lambda b, i, j: (b, i, 0)),  # Q tile
                pl.BlockSpec((1, tk, D), lambda b, i, j: (b, j, 0)),  # K tile
                pl.BlockSpec((1, tk, D), lambda b, i, j: (b, j, 0)),  # V tile
            ],
            out_specs=pl.BlockSpec((1, tq, D), lambda b, i, j: (b, i, 0)),
            scratch_shapes=[
                pltpu.VMEM((tq, 1), jnp.float32),   # running max m
                pltpu.VMEM((tq, 1), jnp.float32),   # running sum l
                pltpu.VMEM((tq, D), jnp.float32),   # output accumulator
            ],
        ),
        compiler_params=pltpu.CompilerParams(
            dimension_semantics=("parallel", "parallel", "arbitrary"),
        ),
    )(q, k, v)


def _reference(query, key, value, dropout_p, inv_scale):
    """Pure-JAX reference with the same bf16 MXU-operand rounding as the kernel."""
    if dropout_p >= 1.0:
        return jnp.zeros_like(query)
    qb = query.astype(jnp.bfloat16)
    kb = key.astype(jnp.bfloat16)
    vb = value.astype(jnp.bfloat16)
    s = jnp.einsum("bqd,bkd->bqk", qb, kb,
                   preferred_element_type=jnp.float32) / inv_scale
    p = jax.nn.softmax(s, axis=-1)
    # (expectation-only for 0 < p < 1; the kernel's RNG stream is TPU-specific)
    out = jnp.einsum("bqk,bkd->bqd", p.astype(jnp.bfloat16), vb,
                     preferred_element_type=jnp.float32)
    return out.astype(query.dtype)


if __name__ == "__main__":
    # Small shapes consistent with the module's (1, 8192, 32) inputs.
    B, S, D = 1, 512, 32
    k0 = jax.random.PRNGKey(0)
    kq, kk, kv = jax.random.split(k0, 3)
    query = jax.random.normal(kq, (B, S, D), dtype=jnp.float32)
    key = jax.random.normal(kk, (B, S, D), dtype=jnp.float32)
    value = jax.random.normal(kv, (B, S, D), dtype=jnp.float32)

    # 1) Exact module config: dropout_p = 1, inv_scale_factor = 1  ->  zeros.
    out = attention(query, key, value,
                    dropout_p=DROPOUT_P, inv_scale=INV_SCALE_FACTOR,
                    tq=256, tk=128)
    out = jax.block_until_ready(out)
    assert out.shape == (B, S, D), out.shape
    assert jnp.allclose(out, jnp.zeros_like(out)), "dropout_p=1 path mismatch"

    # 2) Exercise the flash kernel itself (dropout disabled) against the reference.
    out0 = attention(query, key, value, dropout_p=0.0,
                     inv_scale=INV_SCALE_FACTOR, tq=256, tk=128)
    out0 = jax.block_until_ready(out0)
    ref0 = _reference(query, key, value, 0.0, INV_SCALE_FACTOR)
    assert out0.shape == (B, S, D), out0.shape
    assert jnp.allclose(out0, ref0, atol=2e-2, rtol=2e-2), "mismatch vs reference"

    print("KERNEL_OK")
</pallas_src>

<mosaic_0001>
module attributes {stable_mosaic.version = 11 : i64} {
  func.func @_flash_attention_kernel(%arg0: i32, %arg1: i32, %arg2: i32, %arg3: memref<1x256x32xbf16, #tpu.memory_space<vmem>>, %arg4: memref<1x128x32xbf16, #tpu.memory_space<vmem>>, %arg5: memref<1x128x32xbf16, #tpu.memory_space<vmem>>, %arg6: memref<1x256x32xf32, #tpu.memory_space<vmem>>, %arg7: memref<256x1xf32, #tpu.memory_space<vmem>>, %arg8: memref<256x1xf32, #tpu.memory_space<vmem>>, %arg9: memref<256x32xf32, #tpu.memory_space<vmem>>) attributes {dimension_semantics = [#tpu.dimension_semantics<parallel>, #tpu.dimension_semantics<parallel>, #tpu.dimension_semantics<arbitrary>], iteration_bounds = array<i64: 1, 2, 4>, scalar_prefetch = 0 : i64, scratch_operands = 3 : i64, tpu.core_type = #tpu.core_type<tc>, window_params = [{transform_indices = @transform_0, window_bounds = array<i64: 1, 256, 32>}, {transform_indices = @transform_1, window_bounds = array<i64: 1, 128, 32>}, {transform_indices = @transform_2, window_bounds = array<i64: 1, 128, 32>}, {transform_indices = @transform_3, window_bounds = array<i64: 1, 256, 32>}]} {
    %c0_i32 = arith.constant 0 : i32
    %0 = arith.cmpi eq, %arg2, %c0_i32 : i32
    %1 = arith.extui %0 : i1 to i32
    %c0_i32_0 = arith.constant 0 : i32
    %2 = arith.cmpi ne, %1, %c0_i32_0 : i32
    scf.if %2 {
      %cst_25 = arith.constant 0xFF800000 : f32
      %36 = vector.broadcast %cst_25 : f32 to vector<256x1xf32>
      %c0_26 = arith.constant 0 : index
      %c0_27 = arith.constant 0 : index
      %37 = vector.load %arg7[%c0_26, %c0_27] : memref<256x1xf32, #tpu.memory_space<vmem>>, vector<256x1xf32>
      tpu.vector_store %arg7[%c0_26, %c0_27], %36 {strides = array<i32>} : memref<256x1xf32, #tpu.memory_space<vmem>>, vector<256x1xf32>,
      %cst_28 = arith.constant 0.000000e+00 : f32
      %38 = vector.broadcast %cst_28 : f32 to vector<256x1xf32>
      %c0_29 = arith.constant 0 : index
      %c0_30 = arith.constant 0 : index
      %39 = vector.load %arg8[%c0_29, %c0_30] : memref<256x1xf32, #tpu.memory_space<vmem>>, vector<256x1xf32>
      tpu.vector_store %arg8[%c0_29, %c0_30], %38 {strides = array<i32>} : memref<256x1xf32, #tpu.memory_space<vmem>>, vector<256x1xf32>,
      %cst_31 = arith.constant 0.000000e+00 : f32
      %40 = vector.broadcast %cst_31 : f32 to vector<256x32xf32>
      %c0_32 = arith.constant 0 : index
      %c0_33 = arith.constant 0 : index
      %41 = vector.load %arg9[%c0_32, %c0_33] : memref<256x32xf32, #tpu.memory_space<vmem>>, vector<256x32xf32>
      tpu.vector_store %arg9[%c0_32, %c0_33], %40 {strides = array<i32>} : memref<256x32xf32, #tpu.memory_space<vmem>>, vector<256x32xf32>,
    } else {
    }
    %c0 = arith.constant 0 : index
    %c0_1 = arith.constant 0 : index
    %c0_2 = arith.constant 0 : index
    %3 = vector.load %arg3[%c0, %c0_1, %c0_2] : memref<1x256x32xbf16, #tpu.memory_space<vmem>>, vector<1x256x32xbf16>
    %4 = vector.shape_cast %3 : vector<1x256x32xbf16> to vector<256x32xbf16>
    %c0_3 = arith.constant 0 : index
    %c0_4 = arith.constant 0 : index
    %c0_5 = arith.constant 0 : index
    %5 = vector.load %arg4[%c0_3, %c0_4, %c0_5] : memref<1x128x32xbf16, #tpu.memory_space<vmem>>, vector<1x128x32xbf16>
    %6 = vector.shape_cast %5 : vector<1x128x32xbf16> to vector<128x32xbf16>
    %c0_6 = arith.constant 0 : index
    %c0_7 = arith.constant 0 : index
    %c0_8 = arith.constant 0 : index
    %7 = vector.load %arg5[%c0_6, %c0_7, %c0_8] : memref<1x128x32xbf16, #tpu.memory_space<vmem>>, vector<1x128x32xbf16>
    %8 = vector.shape_cast %7 : vector<1x128x32xbf16> to vector<128x32xbf16>
    %cst = arith.constant dense<0.000000e+00> : vector<256x128xf32>
    %9 = tpu.matmul %4, %6, %cst {dimension_numbers = #tpu.dot_dimension_numbers<[1], [1], [0], [0], [0, 0, 1, 0], [], []>} : vector<256x32xbf16>, vector<128x32xbf16>, vector<256x128xf32> -> vector<256x128xf32>
    %c0_9 = arith.constant 0 : index
    %c0_10 = arith.constant 0 : index
    %10 = vector.load %arg7[%c0_9, %c0_10] : memref<256x1xf32, #tpu.memory_space<vmem>>, vector<256x1xf32>
    %cst_11 = arith.constant dense<0xFF800000> : vector<256xf32>
    %11 = vector.multi_reduction <maximumf>, %9, %cst_11 [1] : vector<256x128xf32> to vector<256xf32>
    %12 = vector.shape_cast %11 : vector<256xf32> to vector<256x1xf32>
    %13 = arith.maximumf %10, %12 : vector<256x1xf32>
    %14 = arith.subf %10, %13 : vector<256x1xf32>
    %15 = math.exp %14 : vector<256x1xf32>
    %16 = vector.broadcast %13 : vector<256x1xf32> to vector<256x128xf32>
    %17 = arith.subf %9, %16 : vector<256x128xf32>
    %18 = math.exp %17 : vector<256x128xf32>
    %c0_12 = arith.constant 0 : index
    %c0_13 = arith.constant 0 : index
    %19 = vector.load %arg8[%c0_12, %c0_13] : memref<256x1xf32, #tpu.memory_space<vmem>>, vector<256x1xf32>
    %20 = arith.mulf %15, %19 : vector<256x1xf32>
    %cst_14 = arith.constant dense<0.000000e+00> : vector<256xf32>
    %21 = vector.multi_reduction <add>, %18, %cst_14 [1] : vector<256x128xf32> to vector<256xf32>
    %22 = vector.shape_cast %21 : vector<256xf32> to vector<256x1xf32>
    %23 = arith.addf %20, %22 : vector<256x1xf32>
    %c0_15 = arith.constant 0 : index
    %c0_16 = arith.constant 0 : index
    %24 = vector.load %arg8[%c0_15, %c0_16] : memref<256x1xf32, #tpu.memory_space<vmem>>, vector<256x1xf32>
    tpu.vector_store %arg8[%c0_15, %c0_16], %23 {strides = array<i32>} : memref<256x1xf32, #tpu.memory_space<vmem>>, vector<256x1xf32>,
    %c0_17 = arith.constant 0 : index
    %c0_18 = arith.constant 0 : index
    %25 = vector.load %arg9[%c0_17, %c0_18] : memref<256x32xf32, #tpu.memory_space<vmem>>, vector<256x32xf32>
    %26 = vector.broadcast %15 : vector<256x1xf32> to vector<256x32xf32>
    %27 = arith.mulf %26, %25 : vector<256x32xf32>
    %28 = arith.truncf %18 : vector<256x128xf32> to vector<256x128xbf16>
    %cst_19 = arith.constant dense<0.000000e+00> : vector<256x32xf32>
    %29 = tpu.matmul %28, %8, %cst_19 {dimension_numbers = #tpu.dot_dimension_numbers<[1], [0], [0], [1], [0, 0, 1, 1], [], []>} : vector<256x128xbf16>, vector<128x32xbf16>, vector<256x32xf32> -> vector<256x32xf32>
    %30 = arith.addf %27, %29 : vector<256x32xf32>
    %c0_20 = arith.constant 0 : index
    %c0_21 = arith.constant 0 : index
    %31 = vector.load %arg9[%c0_20, %c0_21] : memref<256x32xf32, #tpu.memory_space<vmem>>, vector<256x32xf32>
    tpu.vector_store %arg9[%c0_20, %c0_21], %30 {strides = array<i32>} : memref<256x32xf32, #tpu.memory_space<vmem>>, vector<256x32xf32>,
    %c0_22 = arith.constant 0 : index
    %c0_23 = arith.constant 0 : index
    %32 = vector.load %arg7[%c0_22, %c0_23] : memref<256x1xf32, #tpu.memory_space<vmem>>, vector<256x1xf32>
    tpu.vector_store %arg7[%c0_22, %c0_23], %13 {strides = array<i32>} : memref<256x1xf32, #tpu.memory_space<vmem>>, vector<256x1xf32>,
    %c3_i32 = arith.constant 3 : i32
    %33 = arith.cmpi eq, %arg2, %c3_i32 : i32
    %34 = arith.extui %33 : i1 to i32
    %c0_i32_24 = arith.constant 0 : i32
    %35 = arith.cmpi ne, %34, %c0_i32_24 : i32
    scf.if %35 {
      %c0_25 = arith.constant 0 : index
      %c0_26 = arith.constant 0 : index
      %36 = vector.load %arg8[%c0_25, %c0_26] : memref<256x1xf32, #tpu.memory_space<vmem>>, vector<256x1xf32>
      %37 = tpu.reciprocal %36 {approx = true} : vector<256x1xf32> -> vector<256x1xf32>
      %c0_27 = arith.constant 0 : index
      %c0_28 = arith.constant 0 : index
      %38 = vector.load %arg9[%c0_27, %c0_28] : memref<256x32xf32, #tpu.memory_space<vmem>>, vector<256x32xf32>
      %39 = vector.broadcast %37 : vector<256x1xf32> to vector<256x32xf32>
      %40 = arith.mulf %38, %39 : vector<256x32xf32>
      %c0_29 = arith.constant 0 : index
      %c0_30 = arith.constant 0 : index
      %c0_31 = arith.constant 0 : index
      %41 = vector.load %arg6[%c0_29, %c0_30, %c0_31] : memref<1x256x32xf32, #tpu.memory_space<vmem>>, vector<1x256x32xf32>
      %42 = vector.shape_cast %41 : vector<1x256x32xf32> to vector<256x32xf32>
      %43 = vector.shape_cast %40 : vector<256x32xf32> to vector<1x256x32xf32>
      tpu.vector_store %arg6[%c0_29, %c0_30, %c0_31], %43 {strides = array<i32>} : memref<1x256x32xf32, #tpu.memory_space<vmem>>, vector<1x256x32xf32>,
    } else {
    }
    return
  }
  func.func @transform_0(%arg0: i32, %arg1: i32, %arg2: i32) -> (i32, i32, i32) {
    %c0_i32 = arith.constant 0 : i32
    %c0_i32_0 = arith.constant 0 : i32
    return %arg0, %arg1, %c0_i32 : i32, i32, i32
  }
  func.func @transform_1(%arg0: i32, %arg1: i32, %arg2: i32) -> (i32, i32, i32) {
    %c0_i32 = arith.constant 0 : i32
    %c0_i32_0 = arith.constant 0 : i32
    return %arg0, %arg2, %c0_i32 : i32, i32, i32
  }
  func.func @transform_2(%arg0: i32, %arg1: i32, %arg2: i32) -> (i32, i32, i32) {
    %c0_i32 = arith.constant 0 : i32
    %c0_i32_0 = arith.constant 0 : i32
    return %arg0, %arg2, %c0_i32 : i32, i32, i32
  }
  func.func @transform_3(%arg0: i32, %arg1: i32, %arg2: i32) -> (i32, i32, i32) {
    %c0_i32 = arith.constant 0 : i32
    %c0_i32_0 = arith.constant 0 : i32
    return %arg0, %arg1, %c0_i32 : i32, i32, i32
  }
}

</mosaic_0001>

<bundles_post_ra>
// kernel: tpu_custom_call.1
= control target key start
LH: loop header
LB: loop body
LE: loop exit
PB: predicated region body
PF: predicated region fallthrough
CT: control target
= control target key end

     0   :  { %s2851_s12 = smov 0   ;;  %s2853_s13 = smov 0   ;;  %s4042_s0 = inlined_call_operand.vmem [shape: bf16[1,512,32], index: 0, kind: input, shape index: {}]   ;;  %s4043_s1 = inlined_call_operand.vmem [shape: bf16[1,512,32], index: 1, kind: input, shape index: {}]   ;;  %s4044_s2 = inlined_call_operand.vmem [shape: bf16[1,512,32], index: 2, kind: input, shape index: {}]   ;;  %s4045_s3 = inlined_call_operand.vmem [shape: f32[1,512,32], index: 3, kind: output, shape index: {}]  }
   0x1   :  { %s2855_s14 = smov 0   ;;  %s2857_s15 = smov 0  }
   0x2   :  { %s2859_s16 = smov 0  }
   0x3 LB: > { %s25_s17 = sadd.s32 1, %s2817_s14  ;;  %s28_s18 = sadd.s32 1, %s2821_s15  ;;  %s2825_s16 = sphi %s2859_s16, %s13_s16   ;;  %s2821_s15 = sphi %s2857_s15, %s4189_s15   ;;  %s2817_s14 = sphi %s2855_s14, %s4188_s14   ;;  %s2813_s13 = sphi %s2853_s13, %s4187_s13   ;;  %s2809_s12 = sphi %s2851_s12, %s4186_s12  }
   0x4   : > { %p26_p0 = scmp.ge.s32.totalorder %s25_s17, 4  ;;  %p2340_p1 = scmp.ge.s32.totalorder %s2825_s16, 1 }
   0x5   : > { %p199_p2 = scmp.lt.s32.totalorder %s2825_s16, 9 }
   0x6   : > { %s4191_s17 = smov (%p26_p0, %s25_s17), 0  ;;  %s4193_s18 = smov (!%p26_p0, %s28_s18), %s2821_s15 }
   0x7   : > { %p200_p3 = pnand %p2340_p1, %p199_p2  ;;  %p30_p4 = scmp.ge.s32.totalorder %s4193_s18, 2 }
   0x9   : > { %s4195_s18 = smov (%p30_p4, %s4193_s18), 0  ;;  %203 = sbr.rel (%p200_p3) target bundleno = 1194 (0x4aa), region = 32 }
   0xe   : > { %s2341_s19 = sshll.u32 %s2813_s13, 5  ;;  %s2343_s20 = sshll.u32 %s2809_s12, 4 }
   0xf   : > { %p252_p5 = scmp.lt.s32.totalorder %s2341_s19, 63  ;;  %p262_p6 = scmp.lt.s32.totalorder %s2343_s20, 63 }
  0x10   : > { %p2349_p7 = scmp.ne.s32.totalorder %s2809_s12, 0 }
  0x11   : > { %s4197_s19 = smov (!%p252_p5, %s2341_s19), 63  ;;  %s4199_s20 = smov (!%p262_p6, %s2343_s20), 63 }
  0x12   : > { %s2342_s21 = sshll.u32 %s4197_s19, 2  ;;  %s2348_s22 = sshll.u32 %s4197_s19, 3 }
  0x13   : > { %s2887_s25 = scalar_lea.vmem %s4042_s0, %s2342_s21  ;;  %s2344_s26 = sshll.u32 %s4199_s20, 2 }
  0x14   : > { %s2892_s29 = scalar_lea.vmem %s4043_s1, %s2344_s26  ;;  %s2897_s5 = scalar_lea.vmem %s4044_s2, %s2344_s26 }
  0x15   : > { %s2902_s8 = scalar_lea.vmem %s4045_s3, %s2348_s22  ;;  %292 = sbr.rel (%p2349_p7) target bundleno = 123 (0x7b), region = 36 }
  0x1a   : > { %vm293_vm0 = vcmask 7168   ;;  %v2827_v0 = vmov -inf   ;;  %v2828_v1 = vmov 0.0   ;;  %vm358_vm1 = vcmask 261120  }
  0x1b   : > { %294 = vst.msk [vmem:[#allocation2] sm:$0xff] %vm293_vm0, %v2827_v0 }
  0x1c   : > { %295 = vst.msk [vmem:[#allocation2 + $0x8] sm:$0xff] %vm293_vm0, %v2827_v0 }
  0x1d   : > { %296 = vst.msk [vmem:[#allocation2 + $0x10] sm:$0xff] %vm293_vm0, %v2827_v0 }
  0x1e   : > { %297 = vst.msk [vmem:[#allocation2 + $0x18] sm:$0xff] %vm293_vm0, %v2827_v0 }
  0x1f   : > { %298 = vst.msk [vmem:[#allocation2 + $0x20] sm:$0xff] %vm293_vm0, %v2827_v0 }
  0x20   : > { %299 = vst.msk [vmem:[#allocation2 + $0x28] sm:$0xff] %vm293_vm0, %v2827_v0 }
  0x21   : > { %300 = vst.msk [vmem:[#allocation2 + $0x30] sm:$0xff] %vm293_vm0, %v2827_v0 }
  0x22   : > { %301 = vst.msk [vmem:[#allocation2 + $0x38] sm:$0xff] %vm293_vm0, %v2827_v0 }
  0x23   : > { %302 = vst.msk [vmem:[#allocation2 + $0x40] sm:$0xff] %vm293_vm0, %v2827_v0 }
  0x24   : > { %303 = vst.msk [vmem:[#allocation2 + $0x48] sm:$0xff] %vm293_vm0, %v2827_v0 }
  0x25   : > { %304 = vst.msk [vmem:[#allocation2 + $0x50] sm:$0xff] %vm293_vm0, %v2827_v0 }
  0x26   : > { %305 = vst.msk [vmem:[#allocation2 + $0x58] sm:$0xff] %vm293_vm0, %v2827_v0 }
  0x27   : > { %306 = vst.msk [vmem:[#allocation2 + $0x60] sm:$0xff] %vm293_vm0, %v2827_v0 }
  0x28   : > { %307 = vst.msk [vmem:[#allocation2 + $0x68] sm:$0xff] %vm293_vm0, %v2827_v0 }
  0x29   : > { %308 = vst.msk [vmem:[#allocation2 + $0x70] sm:$0xff] %vm293_vm0, %v2827_v0 }
  0x2a   : > { %309 = vst.msk [vmem:[#allocation2 + $0x78] sm:$0xff] %vm293_vm0, %v2827_v0 }
  0x2b   : > { %310 = vst.msk [vmem:[#allocation2 + $0x80] sm:$0xff] %vm293_vm0, %v2827_v0 }
  0x2c   : > { %311 = vst.msk [vmem:[#allocation2 + $0x88] sm:$0xff] %vm293_vm0, %v2827_v0 }
  0x2d   : > { %312 = vst.msk [vmem:[#allocation2 + $0x90] sm:$0xff] %vm293_vm0, %v2827_v0 }
  0x2e   : > { %313 = vst.msk [vmem:[#allocation2 + $0x98] sm:$0xff] %vm293_vm0, %v2827_v0 }
  0x2f   : > { %314 = vst.msk [vmem:[#allocation2 + $0xa0] sm:$0xff] %vm293_vm0, %v2827_v0 }
  0x30   : > { %315 = vst.msk [vmem:[#allocation2 + $0xa8] sm:$0xff] %vm293_vm0, %v2827_v0 }
  0x31   : > { %316 = vst.msk [vmem:[#allocation2 + $0xb0] sm:$0xff] %vm293_vm0, %v2827_v0 }
  0x32   : > { %317 = vst.msk [vmem:[#allocation2 + $0xb8] sm:$0xff] %vm293_vm0, %v2827_v0 }
  0x33   : > { %318 = vst.msk [vmem:[#allocation2 + $0xc0] sm:$0xff] %vm293_vm0, %v2827_v0 }
  0x34   : > { %319 = vst.msk [vmem:[#allocation2 + $0xc8] sm:$0xff] %vm293_vm0, %v2827_v0 }
  0x35   : > { %320 = vst.msk [vmem:[#allocation2 + $0xd0] sm:$0xff] %vm293_vm0, %v2827_v0 }
  0x36   : > { %321 = vst.msk [vmem:[#allocation2 + $0xd8] sm:$0xff] %vm293_vm0, %v2827_v0 }
  0x37   : > { %322 = vst.msk [vmem:[#allocation2 + $0xe0] sm:$0xff] %vm293_vm0, %v2827_v0 }
  0x38   : > { %323 = vst.msk [vmem:[#allocation2 + $0xe8] sm:$0xff] %vm293_vm0, %v2827_v0 }
  0x39   : > { %324 = vst.msk [vmem:[#allocation2 + $0xf0] sm:$0xff] %vm293_vm0, %v2827_v0 }
  0x3a   : > { %325 = vst.msk [vmem:[#allocation2 + $0xf8] sm:$0xff] %vm293_vm0, %v2827_v0 }
  0x3b   : > { %326 = vst.msk [vmem:[#allocation3] sm:$0xff] %vm293_vm0, %v2828_v1 }
  0x3c   : > { %327 = vst.msk [vmem:[#allocation3 + $0x8] sm:$0xff] %vm293_vm0, %v2828_v1 }
  0x3d   : > { %328 = vst.msk [vmem:[#allocation3 + $0x10] sm:$0xff] %vm293_vm0, %v2828_v1 }
  0x3e   : > { %329 = vst.msk [vmem:[#allocation3 + $0x18] sm:$0xff] %vm293_vm0, %v2828_v1 }
  0x3f   : > { %330 = vst.msk [vmem:[#allocation3 + $0x20] sm:$0xff] %vm293_vm0, %v2828_v1 }
  0x40   : > { %331 = vst.msk [vmem:[#allocation3 + $0x28] sm:$0xff] %vm293_vm0, %v2828_v1 }
  0x41   : > { %332 = vst.msk [vmem:[#allocation3 + $0x30] sm:$0xff] %vm293_vm0, %v2828_v1 }
  0x42   : > { %333 = vst.msk [vmem:[#allocation3 + $0x38] sm:$0xff] %vm293_vm0, %v2828_v1 }
  0x43   : > { %334 = vst.msk [vmem:[#allocation3 + $0x40] sm:$0xff] %vm293_vm0, %v2828_v1 }
  0x44   : > { %335 = vst.msk [vmem:[#allocation3 + $0x48] sm:$0xff] %vm293_vm0, %v2828_v1 }
  0x45   : > { %336 = vst.msk [vmem:[#allocation3 + $0x50] sm:$0xff] %vm293_vm0, %v2828_v1 }
  0x46   : > { %337 = vst.msk [vmem:[#allocation3 + $0x58] sm:$0xff] %vm293_vm0, %v2828_v1 }
  0x47   : > { %338 = vst.msk [vmem:[#allocation3 + $0x60] sm:$0xff] %vm293_vm0, %v2828_v1 }
  0x48   : > { %339 = vst.msk [vmem:[#allocation3 + $0x68] sm:$0xff] %vm293_vm0, %v2828_v1 }
  0x49   : > { %340 = vst.msk [vmem:[#allocation3 + $0x70] sm:$0xff] %vm293_vm0, %v2828_v1 }
  0x4a   : > { %341 = vst.msk [vmem:[#allocation3 + $0x78] sm:$0xff] %vm293_vm0, %v2828_v1 }
  0x4b   : > { %342 = vst.msk [vmem:[#allocation3 + $0x80] sm:$0xff] %vm293_vm0, %v2828_v1 }
  0x4c   : > { %343 = vst.msk [vmem:[#allocation3 + $0x88] sm:$0xff] %vm293_vm0, %v2828_v1 }
  0x4d   : > { %344 = vst.msk [vmem:[#allocation3 + $0x90] sm:$0xff] %vm293_vm0, %v2828_v1 }
  0x4e   : > { %345 = vst.msk [vmem:[#allocation3 + $0x98] sm:$0xff] %vm293_vm0, %v2828_v1 }
  0x4f   : > { %346 = vst.msk [vmem:[#allocation3 + $0xa0] sm:$0xff] %vm293_vm0, %v2828_v1 }
  0x50   : > { %347 = vst.msk [vmem:[#allocation3 + $0xa8] sm:$0xff] %vm293_vm0, %v2828_v1 }
  0x51   : > { %348 = vst.msk [vmem:[#allocation3 + $0xb0] sm:$0xff] %vm293_vm0, %v2828_v1 }
  0x52   : > { %349 = vst.msk [vmem:[#allocation3 + $0xb8] sm:$0xff] %vm293_vm0, %v2828_v1 }
  0x53   : > { %350 = vst.msk [vmem:[#allocation3 + $0xc0] sm:$0xff] %vm293_vm0, %v2828_v1 }
  0x54   : > { %351 = vst.msk [vmem:[#allocation3 + $0xc8] sm:$0xff] %vm293_vm0, %v2828_v1 }
  0x55   : > { %352 = vst.msk [vmem:[#allocation3 + $0xd0] sm:$0xff] %vm293_vm0, %v2828_v1 }
  0x56   : > { %353 = vst.msk [vmem:[#allocation3 + $0xd8] sm:$0xff] %vm293_vm0, %v2828_v1 }
  0x57   : > { %354 = vst.msk [vmem:[#allocation3 + $0xe0] sm:$0xff] %vm293_vm0, %v2828_v1 }
  0x58   : > { %355 = vst.msk [vmem:[#allocation3 + $0xe8] sm:$0xff] %vm293_vm0, %v2828_v1 }
  0x59   : > { %356 = vst.msk [vmem:[#allocation3 + $0xf0] sm:$0xff] %vm293_vm0, %v2828_v1 }
  0x5a   : > { %357 = vst.msk [vmem:[#allocation3 + $0xf8] sm:$0xff] %vm293_vm0, %v2828_v1 }
  0x5b   : > { %359 = vst.msk [vmem:[#allocation4] sm:$0xff] %vm358_vm1, %v2828_v1 }
  0x5c   : > { %360 = vst.msk [vmem:[#allocation4 + $0x8] sm:$0xff] %vm358_vm1, %v2828_v1 }
  0x5d   : > { %361 = vst.msk [vmem:[#allocation4 + $0x10] sm:$0xff] %vm358_vm1, %v2828_v1 }
  0x5e   : > { %362 = vst.msk [vmem:[#allocation4 + $0x18] sm:$0xff] %vm358_vm1, %v2828_v1 }
  0x5f   : > { %363 = vst.msk [vmem:[#allocation4 + $0x20] sm:$0xff] %vm358_vm1, %v2828_v1 }
  0x60   : > { %364 = vst.msk [vmem:[#allocation4 + $0x28] sm:$0xff] %vm358_vm1, %v2828_v1 }
  0x61   : > { %365 = vst.msk [vmem:[#allocation4 + $0x30] sm:$0xff] %vm358_vm1, %v2828_v1 }
  0x62   : > { %366 = vst.msk [vmem:[#allocation4 + $0x38] sm:$0xff] %vm358_vm1, %v2828_v1 }
  0x63   : > { %367 = vst.msk [vmem:[#allocation4 + $0x40] sm:$0xff] %vm358_vm1, %v2828_v1 }
  0x64   : > { %368 = vst.msk [vmem:[#allocation4 + $0x48] sm:$0xff] %vm358_vm1, %v2828_v1 }
  0x65   : > { %369 = vst.msk [vmem:[#allocation4 + $0x50] sm:$0xff] %vm358_vm1, %v2828_v1 }
  0x66   : > { %370 = vst.msk [vmem:[#allocation4 + $0x58] sm:$0xff] %vm358_vm1, %v2828_v1 }
  0x67   : > { %371 = vst.msk [vmem:[#allocation4 + $0x60] sm:$0xff] %vm358_vm1, %v2828_v1 }
  0x68   : > { %372 = vst.msk [vmem:[#allocation4 + $0x68] sm:$0xff] %vm358_vm1, %v2828_v1 }
  0x69   : > { %373 = vst.msk [vmem:[#allocation4 + $0x70] sm:$0xff] %vm358_vm1, %v2828_v1 }
  0x6a   : > { %374 = vst.msk [vmem:[#allocation4 + $0x78] sm:$0xff] %vm358_vm1, %v2828_v1 }
  0x6b   : > { %375 = vst.msk [vmem:[#allocation4 + $0x80] sm:$0xff] %vm358_vm1, %v2828_v1 }
  0x6c   : > { %376 = vst.msk [vmem:[#allocation4 + $0x88] sm:$0xff] %vm358_vm1, %v2828_v1 }
  0x6d   : > { %377 = vst.msk [vmem:[#allocation4 + $0x90] sm:$0xff] %vm358_vm1, %v2828_v1 }
  0x6e   : > { %378 = vst.msk [vmem:[#allocation4 + $0x98] sm:$0xff] %vm358_vm1, %v2828_v1 }
  0x6f   : > { %379 = vst.msk [vmem:[#allocation4 + $0xa0] sm:$0xff] %vm358_vm1, %v2828_v1 }
  0x70   : > { %380 = vst.msk [vmem:[#allocation4 + $0xa8] sm:$0xff] %vm358_vm1, %v2828_v1 }
  0x71   : > { %381 = vst.msk [vmem:[#allocation4 + $0xb0] sm:$0xff] %vm358_vm1, %v2828_v1 }
  0x72   : > { %382 = vst.msk [vmem:[#allocation4 + $0xb8] sm:$0xff] %vm358_vm1, %v2828_v1 }
  0x73   : > { %383 = vst.msk [vmem:[#allocation4 + $0xc0] sm:$0xff] %vm358_vm1, %v2828_v1 }
  0x74   : > { %384 = vst.msk [vmem:[#allocation4 + $0xc8] sm:$0xff] %vm358_vm1, %v2828_v1 }
  0x75   : > { %385 = vst.msk [vmem:[#allocation4 + $0xd0] sm:$0xff] %vm358_vm1, %v2828_v1 }
  0x76   : > { %386 = vst.msk [vmem:[#allocation4 + $0xd8] sm:$0xff] %vm358_vm1, %v2828_v1 }
  0x77   : > { %387 = vst.msk [vmem:[#allocation4 + $0xe0] sm:$0xff] %vm358_vm1, %v2828_v1 }
  0x78   : > { %388 = vst.msk [vmem:[#allocation4 + $0xe8] sm:$0xff] %vm358_vm1, %v2828_v1 }
  0x79   : > { %389 = vst.msk [vmem:[#allocation4 + $0xf0] sm:$0xff] %vm358_vm1, %v2828_v1 }
  0x7a   : > { %390 = vst.msk [vmem:[#allocation4 + $0xf8] sm:$0xff] %vm358_vm1, %v2828_v1 }
  0x7b PF: > { %v2520_v2 = vld [vmem:[%s2892_s29 + $0x38] sm:$0xff]  ;;  %vm575_vm2 = vcmask 261120   ;;  %v2519_v4 = vld [vmem:[%s2892_s29 + $0x30] sm:$0xff]  ;;  %v2518_v6 = vld [vmem:[%s2892_s29 + $0x28] sm:$0xff]  ;;  %v2829_v58 = vmov 0   ;;  %vm1377_vm3 = vcmask 7168  }
  0x7c   : > { %v646_v3 = vsel %vm575_vm2, %v2520_v2, 0  ;;  %v643_v5 = vsel %vm575_vm2, %v2519_v4, 0  ;;  %v640_v7 = vsel %vm575_vm2, %v2518_v6, 0  ;;  %v2517_v8 = vld [vmem:[%s2892_s29 + $0x20] sm:$0xff]  ;;  %v2516_v10 = vld [vmem:[%s2892_s29 + $0x18] sm:$0xff]  ;;  %v2515_v12 = vld [vmem:[%s2892_s29 + $0x10] sm:$0xff]  ;;  %2589 = vset.pattern.permute.xlu2 %v2829_v58  ;;  %2590 = vset.pattern.permute.xlu0 %v2829_v58 }
  0x7d   : > { %648 = vmatpush.bf16.xpose.msra.mxu0 %v646_v3  ;;  %2529 = vmatpush.bf16.xpose.msra.mxu2 %v646_v3  ;;  %v637_v9 = vsel %vm575_vm2, %v2517_v8, 0  ;;  %v634_v11 = vsel %vm575_vm2, %v2516_v10, 0  ;;  %v631_v13 = vsel %vm575_vm2, %v2515_v12, 0  ;;  %v2514_v14 = vld [vmem:[%s2892_s29 + $0x8] sm:$0xff]  ;;  %v2513_v16 = vld [vmem:[%s2892_s29] sm:$0xff]  ;;  %v2504_v19 = vld [vmem:[%s2887_s25 + $0x38] sm:$0xff] }
  0x7e   : > { %v628_v15 = vsel %vm575_vm2, %v2514_v14, 0  ;;  %v625_v17 = vsel %vm575_vm2, %v2513_v16, 0  ;;  %v2497_v18 = vld [vmem:[%s2887_s25] sm:$0xff]  ;;  %v2498_v20 = vld [vmem:[%s2887_s25 + $0x8] sm:$0xff]  ;;  %v2499_v22 = vld [vmem:[%s2887_s25 + $0x10] sm:$0xff]  ;;  %2591 = vset.pattern.permute.xlu1 %v2829_v58  ;;  %p2494_p8 = scmp.ne.s32.totalorder %s2809_s12, 3 }
  0x7f   : > { %v2505_v21 = vld [vmem:[%s2887_s25 + $0x40] sm:$0xff]  ;;  %v2506_v23 = vld [vmem:[%s2887_s25 + $0x48] sm:$0xff]  ;;  %v2500_v24 = vld [vmem:[%s2887_s25 + $0x18] sm:$0xff] }
  0x80   : > { %v2507_v25 = vld [vmem:[%s2887_s25 + $0x50] sm:$0xff]  ;;  %v2501_v26 = vld [vmem:[%s2887_s25 + $0x20] sm:$0xff]  ;;  %v2508_v27 = vld [vmem:[%s2887_s25 + $0x58] sm:$0xff] }
  0x81   : > { %v2502_v28 = vld [vmem:[%s2887_s25 + $0x28] sm:$0xff]  ;;  %v2509_v29 = vld [vmem:[%s2887_s25 + $0x60] sm:$0xff]  ;;  %v2503_v30 = vld [vmem:[%s2887_s25 + $0x30] sm:$0xff] }
  0x82   : > { %v2510_v31 = vld [vmem:[%s2887_s25 + $0x68] sm:$0xff]  ;;  %v2511_v32 = vld [vmem:[%s2887_s25 + $0x70] sm:$0xff]  ;;  %v2512_v37 = vld [vmem:[%s2887_s25 + $0x78] sm:$0xff] }
  0x83   : > { %v737_v63 = vld [vmem:[#allocation2] sm:$0xff]  ;;  %v3201_v3 = vld [vmem:[#allocation2 + $0x70] sm:$0xff]  ;;  %v3219_v12 = vld [vmem:[#allocation2 + $0x78] sm:$0xff] }
  0x84   : > { %v3321_v10 = vld [vmem:[#allocation2 + $0xa8] sm:$0xff] }
  0x85   : > { %649 = vmatpush.bf16.xpose.msra.mxu0 %v643_v5  ;;  %2530 = vmatpush.bf16.xpose.msra.mxu2 %v643_v5  ;;  %v3203_v5 = vld [vmem:[#allocation2 + $0x8] sm:$0xff] }
  0x8d   : > { %650 = vmatpush.bf16.xpose.msra.mxu0 %v640_v7  ;;  %2531 = vmatpush.bf16.xpose.msra.mxu2 %v640_v7 }
  0x95   : > { %651 = vmatpush.bf16.xpose.msra.mxu0 %v637_v9  ;;  %2532 = vmatpush.bf16.xpose.msra.mxu2 %v637_v9 }
  0x9d   : > { %652 = vmatpush.bf16.xpose.msra.mxu0 %v634_v11  ;;  %2533 = vmatpush.bf16.xpose.msra.mxu2 %v634_v11 }
  0xa5   : > { %653 = vmatpush.bf16.xpose.msra.mxu0 %v631_v13  ;;  %2534 = vmatpush.bf16.xpose.msra.mxu2 %v631_v13  ;;  %v3221_v13 = vld [vmem:[#allocation2 + $0x10] sm:$0xff] }
  0xad   : > { %654 = vmatpush.bf16.xpose.msra.mxu0 %v628_v15  ;;  %2535 = vmatpush.bf16.xpose.msra.mxu2 %v628_v15 }
  0xb5   : > { %655 = vmatpush.bf16.xpose.msra.mxu0 %v625_v17  ;;  %2536 = vmatpush.bf16.xpose.msra.mxu2 %v625_v17 }
  0xbc   : > { %2446 = vmatmul.msk.bf16.vlgmr.msra.gmra.mxu0 %vm575_vm2, %v2497_v18  ;;  %2453 = vmatmul.msk.bf16.vlgmr.msra.gmra.mxu2 %vm575_vm2, %v2504_v19 }
  0xcc   : > { %2447 = vmatmul.msk.bf16.gmra.mxu0 %vm575_vm2, %v2498_v20  ;;  %2454 = vmatmul.msk.bf16.gmra.mxu2 %vm575_vm2, %v2505_v21  ;;  %v3236_v20 = vld [vmem:[#allocation2 + $0x80] sm:$0xff] }
  0xdc   : > { %2448 = vmatmul.msk.bf16.gmra.mxu0 %vm575_vm2, %v2499_v22  ;;  %2455 = vmatmul.msk.bf16.gmra.mxu2 %vm575_vm2, %v2506_v23 }
  0xec   : > { %2449 = vmatmul.msk.bf16.gmra.mxu0 %vm575_vm2, %v2500_v24  ;;  %2456 = vmatmul.msk.bf16.gmra.mxu2 %vm575_vm2, %v2507_v25  ;;  %v3249_v25 = vld [vmem:[#allocation2 + $0x88] sm:$0xff] }
  0xfc   : > { %2450 = vmatmul.msk.bf16.gmra.mxu0 %vm575_vm2, %v2501_v26  ;;  %2457 = vmatmul.msk.bf16.gmra.mxu2 %vm575_vm2, %v2508_v27  ;;  %v3251_v27 = vld [vmem:[#allocation2 + $0x18] sm:$0xff] }
 0x10c   : > { %2451 = vmatmul.msk.bf16.gmra.mxu0 %vm575_vm2, %v2502_v28  ;;  %2458 = vmatmul.msk.bf16.gmra.mxu2 %vm575_vm2, %v2509_v29 }
 0x11c   : > { %2452 = vmatmul.msk.bf16.gmra.mxu0 %vm575_vm2, %v2503_v30  ;;  %2459 = vmatmul.msk.bf16.gmra.mxu2 %vm575_vm2, %v2510_v31 }
 0x12c   : > { %2460 = vmatmul.msk.bf16.gmra.mxu2 %vm575_vm2, %v2511_v32  ;;  %v3266_v32 = vld [vmem:[#allocation2 + $0x90] sm:$0xff] }
 0x139   : > { %v3111_v33 = vpop.f32.mrf.mxu0 }
 0x13a   : > { %769 = vmax.xlane.f32.xlu0 %v3111_v33 }
 0x13c   : > { %2461 = vmatmul.msk.bf16.gmra.mxu2 %vm575_vm2, %v2512_v37  ;;  %v3268_v37 = vld [vmem:[#allocation2 + $0x20] sm:$0xff] }
 0x13f   : > { %v3114_v34 = vpop.f32.mrf.mxu2 }
 0x140   : > { %797 = vmax.xlane.f32.xlu2 %v3114_v34 }
 0x141   : > { %v3117_v35 = vpop.f32.mrf.mxu0 }
 0x142   : > { %771 = vmax.xlane.f32.xlu0 %v3117_v35 }
 0x147   : > { %v3120_v36 = vpop.f32.mrf.mxu2 }
 0x149   : > { %v3123_v38 = vpop.f32.mrf.mxu0 }
 0x14a   : > { %799 = vmax.xlane.f32.xlu0 %v3120_v36  ;;  %773 = vmax.xlane.f32.xlu1 %v3123_v38 }
 0x14f   : > { %v3128_v39 = vpop.f32.mrf.mxu2 }
 0x151   : > { %v3130_v40 = vpop.f32.mrf.mxu0 }
 0x152   : > { %801 = vmax.xlane.f32.xlu1 %v3128_v39 }
 0x157   : > { %v3133_v41 = vpop.f32.mrf.mxu2 }
 0x158   : > { %803 = vmax.xlane.f32.xlu2 %v3133_v41 }
 0x159   : > { %v3136_v42 = vpop.f32.mrf.mxu0 }
 0x15a   : > { %775 = vmax.xlane.f32.xlu1 %v3130_v40 }
 0x15f   : > { %v3139_v43 = vpop.f32.mrf.mxu2 }
 0x160   : > { %805 = vmax.xlane.f32.xlu0 %v3139_v43  ;;  %777 = vmax.xlane.f32.xlu2 %v3136_v42 }
 0x161   : > { %v3143_v44 = vpop.f32.mrf.mxu0 }
 0x167   : > { %v3145_v45 = vpop.f32.mrf.mxu2 }
 0x168   : > { %807 = vmax.xlane.f32.xlu1 %v3145_v45  ;;  %779 = vmax.xlane.f32.xlu2 %v3143_v44 }
 0x169   : > { %v3149_v46 = vpop.f32.mrf.mxu0 }
 0x16a   : > { %781 = vmax.xlane.f32.xlu0 %v3149_v46 }
 0x16f   : > { %v3152_v47 = vpop.f32.mrf.mxu2 }
 0x170   : > { %809 = vmax.xlane.f32.xlu2 %v3152_v47 }
 0x171   : > { %v3155_v48 = vpop.f32.mrf.mxu0 }
 0x172   : > { %783 = vmax.xlane.f32.xlu1 %v3155_v48 }
 0x177   : > { %v3158_v49 = vpop.f32.mrf.mxu2 }
 0x178   : > { %811 = vmax.xlane.f32.xlu0 %v3158_v49 }
 0x179   : > { %v3161_v50 = vpop.f32.mrf.mxu0 }
 0x17a   : > { %4087 = vst [vmem:[#allocation5_spill] sm:$0xff] %v3161_v50  ;;  %785 = vmax.xlane.f32.xlu2 %v3161_v50  ;;  %v2524_v50 = vld [vmem:[%s2897_s5 + $0x18] sm:$0xff] }
 0x17f   : > { %v3164_v51 = vpop.f32.mrf.mxu2 }
 0x180   : > { %4088 = vst [vmem:[#allocation6_spill] sm:$0xff] %v3164_v51  ;;  %813 = vmax.xlane.f32.xlu1 %v3164_v51 }
 0x181   : > { %v3167_v52 = vpop.f32.mrf.mxu0 }
 0x182   : > { %4089 = vst [vmem:[#allocation7_spill] sm:$0xff] %v3167_v52  ;;  %787 = vmax.xlane.f32.xlu0 %v3167_v52  ;;  %v3431_v52 = vld [vmem:[#allocation2 + $0xd0] sm:$0xff] }
 0x183   : > { %4113 = vst [vmem:[#allocation27_spill] sm:$0xff] %v3431_v52 }
 0x187   : > { %v3170_v53 = vpop.f32.mrf.mxu2 }
 0x188   : > { %4090 = vst [vmem:[#allocation8_spill] sm:$0xff] %v3170_v53  ;;  %815 = vmax.xlane.f32.xlu2 %v3170_v53 }
 0x189   : > { %v3173_v54 = vpop.f32.mrf.mxu0 }
 0x18a   : > { %4091 = vst [vmem:[#allocation9_spill] sm:$0xff] %v3173_v54  ;;  %789 = vmax.xlane.f32.xlu1 %v3173_v54 }
 0x18f   : > { %v3176_v55 = vpop.f32.mrf.mxu2 }
 0x190   : > { %4092 = vst [vmem:[#allocation10_spill] sm:$0xff] %v3176_v55  ;;  %817 = vmax.xlane.f32.xlu0 %v3176_v55 }
 0x191   : > { %v3179_v56 = vpop.f32.mrf.mxu0 }
 0x192   : > { %4093 = vst [vmem:[#allocation11_spill] sm:$0xff] %v3179_v56  ;;  %791 = vmax.xlane.f32.xlu2 %v3179_v56  ;;  %v2528_v56 = vld [vmem:[%s2897_s5 + $0x38] sm:$0xff] }
 0x193   : > { %1698 = vmatpush.bf16.msra.mxu1 %v2528_v56  ;;  %2537 = vmatpush.bf16.msra.mxu3 %v2528_v56 }
 0x197   : > { %v3182_v57 = vpop.f32.mrf.mxu2 }
 0x198   : > { %4094 = vst [vmem:[#allocation12_spill] sm:$0xff] %v3182_v57  ;;  %819 = vmax.xlane.f32.xlu1 %v3182_v57 }
 0x199   : > { %v3185_v59 = vpop.f32.mrf.mxu0 }
 0x19a   : > { %4095 = vst [vmem:[#allocation13_spill] sm:$0xff] %v3185_v59  ;;  %793 = vmax.xlane.f32.xlu0 %v3185_v59 }
 0x19f   : > { %v3188_v60 = vpop.f32.mrf.mxu2 }
 0x1a0   : > { %4096 = vst [vmem:[#allocation14_spill] sm:$0xff] %v3188_v60  ;;  %821 = vmax.xlane.f32.xlu2 %v3188_v60 }
 0x1a1   : > { %v3191_v61 = vpop.f32.mrf.mxu0 }
 0x1a2   : > { %4097 = vst [vmem:[#allocation15_spill] sm:$0xff] %v3191_v61  ;;  %795 = vmax.xlane.f32.xlu1 %v3191_v61 }
 0x1a7   : > { %v3194_v62 = vpop.f32.mrf.mxu2 }
 0x1a8   : > { %4098 = vst [vmem:[#allocation16_spill] sm:$0xff] %v3194_v62  ;;  %823 = vmax.xlane.f32.xlu0 %v3194_v62 }
 0x1ad   : > { %v770_v0 = vpop.xlane.xlu0 %769 }
 0x1ae   : > { %v833_v1 = vmax.f32 %v737_v63, %v770_v0 }
 0x1af   : > { %v3197_v2 = vpop.f32.mrf.mxu2 }
 0x1b0   : > { %4099 = vst [vmem:[#allocation17_spill] sm:$0xff] %v3197_v2  ;;  %825 = vmax.xlane.f32.xlu1 %v3197_v2  ;;  %v865_v11 = vsub.f32 %v737_v63, %v833_v1  ;;  %v3338_v2 = vld [vmem:[#allocation2 + $0xb0] sm:$0xff] }
 0x1b1   : > { %1851 = vst.msk [vmem:[#allocation2] sm:$0xff] %vm1377_vm3, %v833_v1 }
 0x1b2   : > { %v897_v16 = vmul.f32 1.442695, %v865_v11 }
 0x1b3   : > { %v798_v4 = vpop.xlane.xlu2 %797 }
 0x1b4   : > { %v3206_v6 = vmax.f32 %v3201_v3, %v798_v4  ;;  %2592 = vpow2.f32 %v897_v16  ;;  %v3281_v4 = vld [vmem:[#allocation2 + $0x98] sm:$0xff] }
 0x1b5   : > { %v772_v7 = vpop.xlane.xlu0 %771 }
 0x1b6   : > { %1865 = vst.msk [vmem:[#allocation2 + $0x70] sm:$0xff] %vm1377_vm3, %v3206_v6  ;;  %v3213_v9 = vmax.f32 %v3203_v5, %v772_v7  ;;  %v3283_v7 = vld [vmem:[#allocation2 + $0x28] sm:$0xff] }
 0x1b8   : > { %1852 = vst.msk [vmem:[#allocation2 + $0x8] sm:$0xff] %vm1377_vm3, %v3213_v9  ;;  %963 = vperm.xlu2 %2589, %v833_v1  }
 0x1ba   : > { %v3242_v23 = vpop.eup %2592 }
 0x1bb   : > { %4100 = vst [vmem:[#allocation18_spill] sm:$0xff] %v3242_v23 }
 0x1bc   : > { %1033 = vperm.xlu0 %2590, %v3206_v6  }
 0x1bd   : > { %v800_v14 = vpop.xlane.xlu0 %799  ;;  %v774_v15 = vpop.xlane.xlu1 %773 }
 0x1be   : > { %v3225_v17 = vmax.f32 %v3219_v12, %v800_v14  ;;  %v3228_v18 = vmax.f32 %v3221_v13, %v774_v15  ;;  %v3285_v15 = vld [vmem:[#allocation2 + $0x30] sm:$0xff] }
 0x1c0   : > { %1866 = vst.msk [vmem:[#allocation2 + $0x78] sm:$0xff] %vm1377_vm3, %v3225_v17  ;;  %v867_v60 = vsub.f32 %v3221_v13, %v3228_v18  ;;  %v3358_v13 = vld [vmem:[#allocation2 + $0xb8] sm:$0xff] }
 0x1c1   : > { %1853 = vst.msk [vmem:[#allocation2 + $0x10] sm:$0xff] %vm1377_vm3, %v3228_v18 }
 0x1c2   : > { %v901_v55 = vmul.f32 1.442695, %v867_v60 }
 0x1c4   : > { %968 = vperm.xlu0 %2590, %v3213_v9  }
 0x1c5   : > { %v802_v21 = vpop.xlane.xlu1 %801 }
 0x1c6   : > { %v3240_v22 = vmax.f32 %v3236_v20, %v802_v21 }
 0x1c8   : > { %1867 = vst.msk [vmem:[#allocation2 + $0x80] sm:$0xff] %vm1377_vm3, %v3240_v22 }
 0x1c9   : > { %1444 = vperm.xlu1 %2591, %v3242_v23  }
 0x1cb   : > { %v804_v26 = vpop.xlane.xlu2 %803 }
 0x1cc   : > { %v3254_v28 = vmax.f32 %v3249_v25, %v804_v26 }
 0x1cd   : > { %v776_v29 = vpop.xlane.xlu1 %775 }
 0x1ce   : > { %1868 = vst.msk [vmem:[#allocation2 + $0x88] sm:$0xff] %vm1377_vm3, %v3254_v28  ;;  %v3261_v31 = vmax.f32 %v3251_v27, %v776_v29 }
 0x1d0   : > { %1854 = vst.msk [vmem:[#allocation2 + $0x18] sm:$0xff] %vm1377_vm3, %v3261_v31 }
 0x1d1   : > { %973 = vperm.xlu1 %2591, %v3228_v18   ;;  %v3360_v18 = vld [vmem:[#allocation2 + $0x50] sm:$0xff] }
 0x1d3   : > { %v806_v58 = vpop.xlane.xlu0 %805  ;;  %v778_v63 = vpop.xlane.xlu2 %777 }
 0x1d4   : > { %v3271_v0 = vmax.f32 %v3266_v32, %v806_v58  ;;  %v3274_v1 = vmax.f32 %v3268_v37, %v778_v63  ;;  %v3300_v58 = vpop.f32.mrf.mxu2  ;;  %v3305_v63 = vld [vmem:[#allocation2 + $0xa0] sm:$0xff] }
 0x1d5   : > { %4101 = vst [vmem:[#allocation19_spill] sm:$0xff] %v3300_v58 }
 0x1d6   : > { %1869 = vst.msk [vmem:[#allocation2 + $0x90] sm:$0xff] %vm1377_vm3, %v3271_v0 }
 0x1d7   : > { %1855 = vst.msk [vmem:[#allocation2 + $0x20] sm:$0xff] %vm1377_vm3, %v3274_v1 }
 0x1d9   : > { %1043 = vperm.xlu1 %2591, %v3240_v22  }
 0x1db   : > { %v808_v11 = vpop.xlane.xlu1 %807  ;;  %v780_v14 = vpop.xlane.xlu2 %779 }
 0x1dc   : > { %v3288_v16 = vmax.f32 %v3281_v4, %v808_v11  ;;  %v3291_v21 = vmax.f32 %v3283_v7, %v780_v14  ;;  %v3307_v14 = vld [vmem:[#allocation2 + $0x38] sm:$0xff]  ;;  %v3323_v23 = vpop.f32.mrf.mxu2 }
 0x1dd   : > { %v782_v26 = vpop.xlane.xlu0 %781  ;;  %4102 = vst [vmem:[#allocation20_spill] sm:$0xff] %v3323_v23 }
 0x1de   : > { %1870 = vst.msk [vmem:[#allocation2 + $0x98] sm:$0xff] %vm1377_vm3, %v3288_v16  ;;  %v3296_v29 = vmax.f32 %v3285_v15, %v782_v26 }
 0x1df   : > { %1856 = vst.msk [vmem:[#allocation2 + $0x28] sm:$0xff] %vm1377_vm3, %v3291_v21 }
 0x1e0   : > { %1857 = vst.msk [vmem:[#allocation2 + $0x30] sm:$0xff] %vm1377_vm3, %v3296_v29 }
 0x1e1   : > { %827 = vmax.xlane.f32.xlu2 %v3300_v58 }
 0x1e3   : > { %v810_v11 = vpop.xlane.xlu2 %809 }
 0x1e4   : > { %v3310_v30 = vmax.f32 %v3305_v63, %v810_v11  ;;  %v3325_v11 = vld [vmem:[#allocation2 + $0x40] sm:$0xff] }
 0x1e5   : > { %v784_v26 = vpop.xlane.xlu1 %783 }
 0x1e6   : > { %1871 = vst.msk [vmem:[#allocation2 + $0xa0] sm:$0xff] %vm1377_vm3, %v3310_v30  ;;  %v3317_v24 = vmax.f32 %v3307_v14, %v784_v26 }
 0x1e8   : > { %1858 = vst.msk [vmem:[#allocation2 + $0x38] sm:$0xff] %vm1377_vm3, %v3317_v24 }
 0x1eb   : > { %v812_v8 = vpop.xlane.xlu0 %811 }
 0x1ec   : > { %v3328_v58 = vmax.f32 %v3321_v10, %v812_v8  ;;  %v3342_v8 = vld [vmem:[#allocation2 + $0x48] sm:$0xff] }
 0x1ed   : > { %v786_v19 = vpop.xlane.xlu2 %785 }
 0x1ee   : > { %1872 = vst.msk [vmem:[#allocation2 + $0xa8] sm:$0xff] %vm1377_vm3, %v3328_v58  ;;  %829 = vmax.xlane.f32.xlu0 %v3323_v23  ;;  %v3334_v26 = vmax.f32 %v3325_v11, %v786_v19  ;;  %v4103_v23 = vsub.f32 %v3201_v3, %v3206_v6 }
 0x1f0   : > { %1859 = vst.msk [vmem:[#allocation2 + $0x40] sm:$0xff] %vm1377_vm3, %v3334_v26  ;;  %v925_v19 = vmul.f32 1.442695, %v4103_v23 }
 0x1f2   : > { %2594 = vpow2.f32 %v925_v19 }
 0x1f3   : > { %v814_v62 = vpop.xlane.xlu1 %813  ;;  %2596 = vpow2.f32 %v901_v55 }
 0x1f4   : > { %v3345_v61 = vmax.f32 %v3338_v2, %v814_v62 }
 0x1f5   : > { %v788_v59 = vpop.xlane.xlu0 %787 }
 0x1f6   : > { %1873 = vst.msk [vmem:[#allocation2 + $0xb0] sm:$0xff] %vm1377_vm3, %v3345_v61  ;;  %v3353_v57 = vmax.f32 %v3342_v8, %v788_v59  ;;  %v4104_v59 = vsub.f32 %v3203_v5, %v3213_v9  ;;  %v3382_v5 = vpop.f32.mrf.mxu2 }
 0x1f7   : > { %4108 = vst [vmem:[#allocation24_spill] sm:$0xff] %v3382_v5 }
 0x1f8   : > { %1860 = vst.msk [vmem:[#allocation2 + $0x48] sm:$0xff] %vm1377_vm3, %v3353_v57  ;;  %v899_v60 = vmul.f32 1.442695, %v4104_v59  ;;  %v3373_v19 = vpop.eup %2594 }
 0x1f9   : > { %1038 = vperm.xlu2 %2589, %v3225_v17   ;;  %4105 = vst [vmem:[#allocation21_spill] sm:$0xff] %v3373_v19  ;;  %v3377_v55 = vpop.eup %2596 }
 0x1fa   : > { %4106 = vst [vmem:[#allocation22_spill] sm:$0xff] %v3377_v55  ;;  %2598 = vpow2.f32 %v899_v60 }
 0x1fb   : > { %v816_v62 = vpop.xlane.xlu2 %815 }
 0x1fc   : > { %v3363_v3 = vmax.f32 %v3358_v13, %v816_v62  ;;  %v3380_v62 = vld [vmem:[#allocation2 + $0xc0] sm:$0xff] }
 0x1fd   : > { %v790_v6 = vpop.xlane.xlu1 %789  ;;  %4107 = vst [vmem:[#allocation23_spill] sm:$0xff] %v3380_v62 }
 0x1fe   : > { %1874 = vst.msk [vmem:[#allocation2 + $0xb8] sm:$0xff] %vm1377_vm3, %v3363_v3  ;;  %v3371_v23 = vmax.f32 %v3360_v18, %v790_v6  ;;  %v3386_v6 = vld [vmem:[#allocation2 + $0x58] sm:$0xff] }
 0x200   : > { %1861 = vst.msk [vmem:[#allocation2 + $0x50] sm:$0xff] %vm1377_vm3, %v3371_v23 }
 0x201   : > { %1514 = vperm.xlu2 %2589, %v3373_v19   ;;  %v3400_v19 = vpop.eup %2598 }
 0x202   : > { %1454 = vperm.xlu0 %2590, %v3377_v55   ;;  %v4109_v55 = vsub.f32 %v3236_v20, %v3240_v22  ;;  %4110 = vst [vmem:[#allocation25_spill] sm:$0xff] %v3400_v19  ;;  %v3411_v20 = vld [vmem:[#allocation2 + $0x60] sm:$0xff] }
 0x203   : > { %v818_v9 = vpop.xlane.xlu0 %817  ;;  %831 = vmax.xlane.f32.xlu1 %v3382_v5 }
 0x204   : > { %v3389_v59 = vmax.f32 %v3380_v62, %v818_v9  ;;  %v929_v5 = vmul.f32 1.442695, %v4109_v55  ;;  %v2527_v9 = vld [vmem:[%s2897_s5 + $0x30] sm:$0xff]  ;;  %v3406_v62 = vld [vmem:[#allocation2 + $0xc8] sm:$0xff] }
 0x205   : > { %v792_v54 = vpop.xlane.xlu2 %791  ;;  %1699 = vmatpush.bf16.msra.mxu1 %v2527_v9  ;;  %2538 = vmatpush.bf16.msra.mxu3 %v2527_v9  ;;  %v2526_v55 = vld [vmem:[%s2897_s5 + $0x28] sm:$0xff] }
 0x206   : > { %1875 = vst.msk [vmem:[#allocation2 + $0xc0] sm:$0xff] %vm1377_vm3, %v3389_v59  ;;  %v3395_v60 = vmax.f32 %v3386_v6, %v792_v54  ;;  %2600 = vpow2.f32 %v929_v5  ;;  %v869_v54 = vsub.f32 %v3268_v37, %v3274_v1  ;;  %v2525_v37 = vld [vmem:[%s2897_s5 + $0x20] sm:$0xff] }
 0x208   : > { %1862 = vst.msk [vmem:[#allocation2 + $0x58] sm:$0xff] %vm1377_vm3, %v3395_v60  ;;  %v905_v5 = vmul.f32 1.442695, %v869_v54  ;;  %v3434_v54 = vld [vmem:[#allocation2 + $0x68] sm:$0xff] }
 0x209   : > { %1449 = vperm.xlu2 %2589, %v3400_v19   ;;  %1700 = vmatpush.bf16.msra.mxu1 %v2526_v55 }
 0x20a   : > { %1048 = vperm.xlu0 %2590, %v3254_v28   ;;  %2539 = vmatpush.bf16.msra.mxu3 %v2526_v55  ;;  %2602 = vpow2.f32 %v905_v5  ;;  %v2523_v5 = vld [vmem:[%s2897_s5 + $0x10] sm:$0xff] }
 0x20b   : > { %v820_v56 = vpop.xlane.xlu1 %819 }
 0x20c   : > { %v3414_v22 = vmax.f32 %v3406_v62, %v820_v56  ;;  %v3425_v9 = vpop.eup %2600  ;;  %v4112_v56 = vsub.f32 %v3219_v12, %v3225_v17  ;;  %v868_v12 = vsub.f32 %v3251_v27, %v3261_v31  ;;  %v3453_v27 = vld [vmem:[#allocation2 + $0xd8] sm:$0xff] }
 0x20d   : > { %v794_v51 = vpop.xlane.xlu0 %793  ;;  %4111 = vst [vmem:[#allocation26_spill] sm:$0xff] %v3425_v9  ;;  %1701 = vmatpush.bf16.msra.mxu1 %v2525_v37 }
 0x20e   : > { %1876 = vst.msk [vmem:[#allocation2 + $0xc8] sm:$0xff] %vm1377_vm3, %v3414_v22  ;;  %v3420_v19 = vmax.f32 %v3411_v20, %v794_v51  ;;  %v927_v53 = vmul.f32 1.442695, %v4112_v56  ;;  %2540 = vmatpush.bf16.msra.mxu3 %v2525_v37 }
 0x210   : > { %1863 = vst.msk [vmem:[#allocation2 + $0x60] sm:$0xff] %vm1377_vm3, %v3420_v19  ;;  %2604 = vpow2.f32 %v927_v53  ;;  %v3450_v37 = vpop.eup %2602  ;;  %v903_v53 = vmul.f32 1.442695, %v868_v12  ;;  %v2522_v12 = vld [vmem:[%s2897_s5 + $0x8] sm:$0xff] }
 0x211   : > { %978 = vperm.xlu2 %2589, %v3261_v31   ;;  %1702 = vmatpush.bf16.msra.mxu1 %v2524_v50  ;;  %4114 = vst [vmem:[#allocation28_spill] sm:$0xff] %v3450_v37 }
 0x212   : > { %1524 = vperm.xlu0 %2590, %v3425_v9   ;;  %2541 = vmatpush.bf16.msra.mxu3 %v2524_v50  ;;  %v884_v50 = vsub.f32 %v3281_v4, %v3288_v16  ;;  %2606 = vpow2.f32 %v903_v53  ;;  %v3472_v4 = vld [vmem:[#allocation2 + $0xe0] sm:$0xff] }
 0x213   : > { %v822_v51 = vpop.xlane.xlu2 %821 }
 0x214   : > { %v3437_v55 = vmax.f32 %v3431_v52, %v822_v51  ;;  %v935_v52 = vmul.f32 1.442695, %v884_v50 }
 0x215   : > { %v796_v17 = vpop.xlane.xlu1 %795  ;;  %1703 = vmatpush.bf16.msra.mxu1 %v2523_v5 }
 0x216   : > { %1877 = vst.msk [vmem:[#allocation2 + $0xd0] sm:$0xff] %vm1377_vm3, %v3437_v55  ;;  %v3445_v56 = vmax.f32 %v3434_v54, %v796_v17  ;;  %v3456_v31 = vpop.eup %2604  ;;  %2542 = vmatpush.bf16.msra.mxu3 %v2523_v5 }
 0x218   : > { %1864 = vst.msk [vmem:[#allocation2 + $0x68] sm:$0xff] %vm1377_vm3, %v3445_v56  ;;  %v3475_v5 = vpop.eup %2606 }
 0x219   : > { %983 = vperm.xlu2 %2589, %v3274_v1   ;;  %v4115_v1 = vsub.f32 %v3249_v25, %v3254_v28  ;;  %1704 = vmatpush.bf16.msra.mxu1 %v2522_v12  ;;  %4116 = vst [vmem:[#allocation29_spill] sm:$0xff] %v3475_v5 }
 0x21a   : > { %1464 = vperm.xlu0 %2590, %v3450_v37   ;;  %v2521_v37 = vld [vmem:[%s2897_s5] sm:$0xff]  ;;  %2543 = vmatpush.bf16.msra.mxu3 %v2522_v12 }
 0x21b   : > { %v824_v51 = vpop.xlane.xlu0 %823  ;;  %v931_v9 = vmul.f32 1.442695, %v4115_v1 }
 0x21c   : > { %v3461_v17 = vmax.f32 %v3453_v27, %v824_v51  ;;  %1519 = vperm.xlu1 %2591, %v3456_v31  }
 0x21d   : > { %2608 = vpow2.f32 %v931_v9  ;;  %1705 = vmatpush.bf16.msra.mxu1 %v2521_v37  ;;  %v870_v9 = vsub.f32 %v3283_v7, %v3291_v21 }
 0x21e   : > { %1878 = vst.msk [vmem:[#allocation2 + $0xd8] sm:$0xff] %vm1377_vm3, %v3461_v17  ;;  %2610 = vpow2.f32 %v935_v52  ;;  %2544 = vmatpush.bf16.msra.mxu3 %v2521_v37  ;;  %v872_v52 = vsub.f32 %v3307_v14, %v3317_v24  ;;  %v883_v37 = vsub.f32 %v3266_v32, %v3271_v0 }
 0x21f   : > { %v907_v51 = vmul.f32 1.442695, %v870_v9 }
 0x220   : > { %v911_v1 = vmul.f32 1.442695, %v872_v52 }
 0x221   : > { %1053 = vperm.xlu2 %2589, %v3271_v0   ;;  %2612 = vpow2.f32 %v907_v51 }
 0x222   : > { %1063 = vperm.xlu0 %2590, %v3310_v30   ;;  %2614 = vpow2.f32 %v911_v1 }
 0x223   : > { %v826_v25 = vpop.xlane.xlu1 %825  ;;  %v3483_v53 = vpop.eup %2608 }
 0x224   : > { %v3478_v28 = vmax.f32 %v3472_v4, %v826_v25  ;;  %1459 = vperm.xlu1 %2591, %v3475_v5   ;;  %4117 = vst [vmem:[#allocation30_spill] sm:$0xff] %v3483_v53  ;;  %v3485_v50 = vpop.eup %2610  ;;  %v964_v25 = vpop.permute.xlu2 %963  ;;  %v933_v5 = vmul.f32 1.442695, %v883_v37 }
 0x225   : > { %v1121_v7 = vsub.f32 %v3111_v33, %v964_v25 }
 0x226   : > { %1879 = vst.msk [vmem:[#allocation2 + $0xe0] sm:$0xff] %vm1377_vm3, %v3478_v28  ;;  %2616 = vpow2.f32 %v933_v5 }
 0x227   : > { %v3503_v0 = vpop.eup %2612 }
 0x228   : > { %4118 = vst [vmem:[#allocation31_spill] sm:$0xff] %v3503_v0  ;;  %v3505_v9 = vpop.eup %2614 }
 0x229   : > { %1529 = vperm.xlu2 %2589, %v3483_v53  }
 0x22a   : > { %1539 = vperm.xlu0 %2590, %v3485_v50  }
 0x22c   : > { %988 = vperm.xlu1 %2591, %v3291_v21   ;;  %v1153_v21 = vmul.f32 1.442695, %v1121_v7  ;;  %v3509_v33 = vpop.eup %2616 }
 0x22e   : > { %v3496_v12 = vpop.permute.xlu0 %1033  ;;  %2618 = vpow2.f32 %v1153_v21 }
 0x231   : > { %993 = vperm.xlu2 %2589, %v3296_v29  }
 0x232   : > { %1003 = vperm.xlu0 %2590, %v3334_v26  }
 0x234   : > { %1058 = vperm.xlu1 %2591, %v3288_v16   ;;  %v871_v16 = vsub.f32 %v3285_v15, %v3296_v29  ;;  %v3517_v37 = vpop.eup %2618  ;;  %v875_v15 = vsub.f32 %v3360_v18, %v3371_v23 }
 0x236   : > { %v969_v14 = vpop.permute.xlu0 %968  ;;  %v909_v1 = vmul.f32 1.442695, %v871_v16  ;;  %v3598_v16 = vld [vmem:[#allocation2 + $0xf8] sm:$0xff] }
 0x237   : > { %v1122_v32 = vsub.f32 %v3117_v35, %v969_v14  ;;  %v4119_v35 = vsub.f32 %v3305_v63, %v3310_v30  ;;  %v917_v30 = vmul.f32 1.442695, %v875_v15  ;;  %v873_v63 = vsub.f32 %v3325_v11, %v3334_v26 }
 0x238   : > { %v878_v11 = vsub.f32 %v3434_v54, %v3445_v56  ;;  %v874_v14 = vsub.f32 %v3342_v8, %v3353_v57  ;;  %v3564_v8 = vld [vmem:[#allocation2 + $0xf0] sm:$0xff]  ;;  %v876_v15 = vsub.f32 %v3386_v6, %v3395_v60 }
 0x239   : > { %v1155_v52 = vmul.f32 1.442695, %v1122_v32  ;;  %1469 = vperm.xlu2 %2589, %v3503_v0   ;;  %v937_v5 = vmul.f32 1.442695, %v4119_v35  ;;  %v913_v18 = vmul.f32 1.442695, %v873_v63 }
 0x23a   : > { %1479 = vperm.xlu0 %2590, %v3505_v9  }
 0x23b   : > { %2620 = vpow2.f32 %v1155_v52  ;;  %v923_v52 = vmul.f32 1.442695, %v878_v11  ;;  %v3558_v54 = vpop.permute.xlu1 %1444 }
 0x23c   : > { %1534 = vperm.xlu1 %2591, %v3509_v33   ;;  %2622 = vpow2.f32 %v937_v5  ;;  %v915_v5 = vmul.f32 1.442695, %v874_v14 }
 0x23d   : > { %2624 = vpow2.f32 %v909_v1 }
 0x23e   : > { %2626 = vpow2.f32 %v917_v30 }
 0x23f   : > { %2628 = vpow2.f32 %v913_v18 }
 0x240   : > { %2630 = vpow2.f32 %v923_v52 }
 0x241   : > { %v3519_v51 = vpop.eup %2620  ;;  %1068 = vperm.xlu2 %2589, %v3328_v58   ;;  %2632 = vpow2.f32 %v915_v5 }
 0x242   : > { %1078 = vperm.xlu0 %2590, %v3363_v3   ;;  %v1634_v25 = vpack.c.bf16 %v3519_v51, %v3517_v37  ;;  %v3528_v29 = vpop.eup %2622 }
 0x243   : > { %4120 = vst [vmem:[#allocation32_spill] sm:$0xff] %v3528_v29  ;;  %v3534_v7 = vpop.eup %2624  ;;  %v974_v18 = vpop.permute.xlu1 %973 }
 0x244   : > { %1706 = vmatmul.bf16.vlgmr.msra.gmra.mxu1 %v1634_v25  ;;  %998 = vperm.xlu1 %2591, %v3317_v24   ;;  %4121 = vst [vmem:[#allocation33_spill] sm:$0xff] %v3534_v7  ;;  %v3537_v21 = vpop.eup %2626  ;;  %v3541_v24 = vld [vmem:[#allocation2 + $0xe8] sm:$0xff]  ;;  %v1123_v5 = vsub.f32 %v3123_v38, %v974_v18 }
 0x245   : > { %v3555_v35 = vpop.eup %2628 }
 0x246   : > { %4122 = vst [vmem:[#allocation34_spill] sm:$0xff] %v3555_v35  ;;  %v3566_v1 = vpop.eup %2630 }
 0x247   : > { %4123 = vst [vmem:[#allocation35_spill] sm:$0xff] %v3566_v1  ;;  %v3575_v63 = vpop.eup %2632 }
 0x248   : > { %4124 = vst [vmem:[#allocation36_spill] sm:$0xff] %v3575_v63 }
 0x249   : > { %1544 = vperm.xlu2 %2589, %v3528_v29  }
 0x24a   : > { %1018 = vperm.xlu0 %2590, %v3395_v60   ;;  %v877_v60 = vsub.f32 %v3411_v20, %v3420_v19 }
 0x24b   : > { %v1044_v14 = vpop.permute.xlu1 %1043 }
 0x24c   : > { %1474 = vperm.xlu1 %2591, %v3534_v7   ;;  %v1137_v38 = vsub.f32 %v3128_v39, %v1044_v14 }
 0x251   : > { %1008 = vperm.xlu2 %2589, %v3353_v57  }
 0x252   : > { %1494 = vperm.xlu0 %2590, %v3537_v21  }
 0x254   : > { %v828_v26 = vpop.xlane.xlu2 %827  ;;  %1073 = vperm.xlu1 %2591, %v3345_v61  }
 0x255   : > { %v3549_v32 = vmax.f32 %v3541_v24, %v828_v26  ;;  %v919_v26 = vmul.f32 1.442695, %v876_v15  ;;  %v1157_v15 = vmul.f32 1.442695, %v1123_v5 }
 0x257   : > { %1880 = vst.msk [vmem:[#allocation2 + $0xe8] sm:$0xff] %vm1377_vm3, %v3549_v32  ;;  %2634 = vpow2.f32 %v919_v26 }
 0x259   : > { %1484 = vperm.xlu2 %2589, %v3555_v35  }
 0x25a   : > { %1093 = vperm.xlu0 %2590, %v3437_v55  }
 0x25c   : > { %v3561_v57 = vpop.permute.xlu2 %1038  ;;  %1013 = vperm.xlu1 %2591, %v3371_v23  }
 0x25d   : > { %v3591_v52 = vpop.eup %2634 }
 0x25e   : > { %4126 = vst [vmem:[#allocation38_spill] sm:$0xff] %v3591_v52 }
 0x261   : > { %1083 = vperm.xlu2 %2589, %v3389_v59   ;;  %v830_v25 = vpop.xlane.xlu0 %829 }
 0x262   : > { %1509 = vperm.xlu0 %2590, %v3566_v1   ;;  %v3573_v30 = vmax.f32 %v3564_v8, %v830_v25  ;;  %v921_v25 = vmul.f32 1.442695, %v877_v60  ;;  %v1135_v1 = vsub.f32 %v3114_v34, %v3496_v12 }
 0x264   : > { %v3577_v23 = vpop.permute.xlu2 %1514  ;;  %1489 = vperm.xlu1 %2591, %v3575_v63   ;;  %1881 = vst.msk [vmem:[#allocation2 + $0xf0] sm:$0xff] %vm1377_vm3, %v3573_v30  ;;  %2636 = vpow2.f32 %v921_v25 }
 0x265   : > { %4125 = vst [vmem:[#allocation37_spill] sm:$0xff] %v3577_v23  ;;  %2638 = vpow2.f32 %v1157_v15 }
 0x269   : > { %1023 = vperm.xlu2 %2589, %v3420_v19  }
 0x26a   : > { %1108 = vperm.xlu0 %2590, %v3549_v32  }
 0x26c   : > { %v3586_v6 = vpop.permute.xlu2 %1449  ;;  %1088 = vperm.xlu1 %2591, %v3414_v22  }
 0x271   : > { %1499 = vperm.xlu2 %2589, %v3591_v52   ;;  %v887_v52 = vsub.f32 %v3338_v2, %v3345_v61 }
 0x274   : > { %v979_v11 = vpop.permute.xlu2 %978  ;;  %v3595_v26 = vpop.permute.xlu0 %1454  ;;  %1028 = vperm.xlu1 %2591, %v3445_v56  }
 0x275   : > { %v1124_v35 = vsub.f32 %v3130_v40, %v979_v11  ;;  %v3608_v56 = vpop.eup %2636  ;;  %v1185_v40 = vmul.f32 1.442695, %v1137_v38 }
 0x276   : > { %v832_v19 = vpop.xlane.xlu1 %831  ;;  %4127 = vst [vmem:[#allocation39_spill] sm:$0xff] %v3608_v56  ;;  %v3612_v11 = vpop.eup %2638 }
 0x277   : > { %v1159_v20 = vmul.f32 1.442695, %v1124_v35  ;;  %v3602_v29 = vmax.f32 %v3598_v16, %v832_v19 }
 0x279   : > { %2640 = vpow2.f32 %v1159_v20  ;;  %1882 = vst.msk [vmem:[#allocation2 + $0xf8] sm:$0xff] %vm1377_vm3, %v3602_v29  ;;  %1098 = vperm.xlu2 %2589, %v3461_v17   ;;  %v941_v20 = vmul.f32 1.442695, %v887_v52  ;;  %v1181_v52 = vmul.f32 1.442695, %v1135_v1 }
 0x27a   : > { %2642 = vpow2.f32 %v1185_v40 }
 0x27c   : > { %v984_v18 = vpop.permute.xlu2 %983  ;;  %v1049_v60 = vpop.permute.xlu0 %1048  ;;  %1504 = vperm.xlu1 %2591, %v3608_v56  }
 0x27d   : > { %v1138_v35 = vsub.f32 %v3133_v41, %v1049_v60  ;;  %v1125_v56 = vsub.f32 %v3136_v42, %v984_v18 }
 0x27f   : > { %v3614_v5 = vpop.eup %2640  ;;  %v1187_v39 = vmul.f32 1.442695, %v1138_v35  ;;  %v1161_v63 = vmul.f32 1.442695, %v1125_v56 }
 0x280   : > { %v1635_v14 = vpack.c.bf16 %v3614_v5, %v3612_v11  ;;  %v3622_v19 = vpop.eup %2642 }
 0x281   : > { %1113 = vperm.xlu2 %2589, %v3573_v30   ;;  %2644 = vpow2.f32 %v1187_v39 }
 0x282   : > { %1711 = vmatmul.bf16.gmra.mxu1 %v1635_v14  ;;  %2646 = vpow2.f32 %v941_v20 }
 0x283   : > { %2648 = vpow2.f32 %v1161_v63 }
 0x284   : > { %v1054_v25 = vpop.permute.xlu2 %1053  ;;  %v3619_v15 = vpop.permute.xlu0 %1524  ;;  %1103 = vperm.xlu1 %2591, %v3478_v28  }
 0x285   : > { %4128 = vst [vmem:[#allocation40_spill] sm:$0xff] %v3619_v15  ;;  %v1139_v2 = vsub.f32 %v3139_v43, %v1054_v25  ;;  %v893_v43 = vsub.f32 %v3472_v4, %v3478_v28 }
 0x287   : > { %v3624_v41 = vpop.eup %2644  ;;  %v1189_v12 = vmul.f32 1.442695, %v1139_v2  ;;  %v953_v25 = vmul.f32 1.442695, %v893_v43 }
 0x28c   : > { %v3628_v38 = vpop.permute.xlu2 %1529  ;;  %v3630_v60 = vpop.permute.xlu0 %1464 }
 0x28d   : > { %4129 = vst [vmem:[#allocation41_spill] sm:$0xff] %v3628_v38 }
 0x28e   : > { %v3632_v40 = vpop.permute.xlu1 %1519 }
 0x28f   : > { %4130 = vst [vmem:[#allocation42_spill] sm:$0xff] %v3632_v40  ;;  %v1136_v40 = vsub.f32 %v3120_v36, %v3561_v57 }
 0x291   : > { %v1183_v34 = vmul.f32 1.442695, %v1136_v40 }
 0x294   : > { %v994_v35 = vpop.permute.xlu2 %993  ;;  %1281 = vadd.xlane.f32.xlu0 %v3517_v37  ;;  %v1064_v14 = vpop.permute.xlu0 %1063  ;;  %v890_v37 = vsub.f32 %v3406_v62, %v3414_v22 }
 0x295   : > { %v1127_v40 = vsub.f32 %v3149_v46, %v994_v35  ;;  %v1141_v2 = vsub.f32 %v3152_v47, %v1064_v14  ;;  %v886_v14 = vsub.f32 %v3321_v10, %v3328_v58 }
 0x296   : > { %v3635_v39 = vpop.permute.xlu1 %1459  ;;  %v947_v56 = vmul.f32 1.442695, %v890_v37 }
 0x297   : > { %v1193_v46 = vmul.f32 1.442695, %v1141_v2 }
 0x29c   : > { %v3640_v15 = vpop.permute.xlu2 %1469  ;;  %v3649_v61 = vpop.permute.xlu0 %1539 }
 0x29e   : > { %v989_v38 = vpop.permute.xlu1 %988 }
 0x29f   : > { %v1126_v0 = vsub.f32 %v3143_v44, %v989_v38  ;;  %v3652_v38 = vpop.eup %2646 }
 0x2a0   : > { %v3655_v22 = vpop.eup %2648 }
 0x2a1   : > { %v1163_v42 = vmul.f32 1.442695, %v1126_v0 }
 0x2a3   : > { %2650 = vpow2.f32 %v1163_v42 }
 0x2a4   : > { %v1069_v18 = vpop.permute.xlu2 %1068  ;;  %2652 = vpow2.f32 %v1181_v52  ;;  %v1004_v1 = vpop.permute.xlu0 %1003 }
 0x2a5   : > { %2654 = vpow2.f32 %v947_v56  ;;  %v1142_v42 = vsub.f32 %v3158_v49, %v1069_v18  ;;  %v1165_v56 = vmul.f32 1.442695, %v1127_v40  ;;  %v888_v49 = vsub.f32 %v3358_v13, %v3363_v3  ;;  %v1410_v18 = vld [vmem:[#allocation4] sm:$0xff] }
 0x2a6   : > { %v1059_v44 = vpop.permute.xlu1 %1058  ;;  %2656 = vpow2.f32 %v1183_v34  ;;  %v1602_v13 = vmul.f32 %v3558_v54, %v1410_v18  ;;  %v4134_v3 = vld [vmem:[#allocation5_spill] sm:$0xff] }
 0x2a7   : > { %v1140_v62 = vsub.f32 %v3145_v45, %v1059_v44  ;;  %2658 = vpow2.f32 %v1189_v12  ;;  %v1195_v12 = vmul.f32 1.442695, %v1142_v42  ;;  %v943_v40 = vmul.f32 1.442695, %v888_v49  ;;  %v4133_v42 = vld [vmem:[#allocation27_spill] sm:$0xff] }
 0x2a8   : > { %1554 = vperm.xlu0 %2590, %v3652_v38   ;;  %v891_v2 = vsub.f32 %v4133_v42, %v3437_v55  ;;  %v1129_v10 = vsub.f32 %v4134_v3, %v1004_v1  ;;  %v1411_v1 = vld [vmem:[#allocation4 + $0x8] sm:$0xff]  ;;  %v4138_v3 = vld [vmem:[#allocation23_spill] sm:$0xff] }
 0x2a9   : > { %v3658_v36 = vpop.eup %2650  ;;  %v1191_v0 = vmul.f32 1.442695, %v1140_v62 }
 0x2aa   : > { %1283 = vadd.xlane.f32.xlu2 %v3519_v51  ;;  %v1636_v57 = vpack.c.bf16 %v3658_v36, %v3655_v22  ;;  %v3667_v63 = vpop.eup %2652  ;;  %v949_v42 = vmul.f32 1.442695, %v891_v2  ;;  %v1169_v54 = vmul.f32 1.442695, %v1129_v10 }
 0x2ab   : > { %2660 = vpow2.f32 %v1191_v0  ;;  %v3669_v20 = vpop.eup %2654 }
 0x2ac   : > { %v3665_v45 = vpop.permute.xlu2 %1544  ;;  %1716 = vmatmul.bf16.gmra.mxu1 %v1636_v57  ;;  %4131 = vst [vmem:[#allocation43_spill] sm:$0xff] %v3669_v20  ;;  %v3674_v28 = vpop.eup %2656  ;;  %2662 = vpow2.f32 %v953_v25 }
 0x2ad   : > { %v3676_v51 = vpop.eup %2658  ;;  %v3687_v44 = vpop.permute.xlu0 %1479  ;;  %2664 = vpow2.f32 %v1165_v56 }
 0x2ae   : > { %1309 = vadd.xlane.f32.xlu1 %v3667_v63  ;;  %v3672_v4 = vpop.permute.xlu1 %1534  ;;  %2666 = vpow2.f32 %v1195_v12  ;;  %v939_v12 = vmul.f32 1.442695, %v886_v14 }
 0x2af   : > { %2668 = vpow2.f32 %v1193_v46  ;;  %v4135_v46 = vld [vmem:[#allocation7_spill] sm:$0xff] }
 0x2b0   : > { %1569 = vperm.xlu0 %2590, %v3669_v20  }
 0x2b1   : > { %v3680_v37 = vpop.eup %2660 }
 0x2b2   : > { %1311 = vadd.xlane.f32.xlu2 %v3674_v28  ;;  %v1643_v52 = vpack.c.bf16 %v3680_v37, %v3676_v51  ;;  %v3689_v62 = vpop.eup %2662 }
 0x2b3   : > { %4132 = vst [vmem:[#allocation44_spill] sm:$0xff] %v3689_v62  ;;  %v3697_v0 = vpop.eup %2664 }
 0x2b4   : > { %v1009_v34 = vpop.permute.xlu2 %1008  ;;  %1751 = vmatmul.bf16.vlgmr.msra.gmra.mxu3 %v1643_v52 }
 0x2b5   : > { %v1079_v52 = vpop.permute.xlu0 %1078 }
 0x2b6   : > { %v999_v35 = vpop.permute.xlu1 %998 }
 0x2b7   : > { %v1128_v43 = vsub.f32 %v3155_v48, %v999_v35  ;;  %v3703_v48 = vpop.eup %2666  ;;  %v1130_v35 = vsub.f32 %v4135_v46, %v1009_v34  ;;  %v889_v46 = vsub.f32 %v4138_v3, %v3389_v59  ;;  %v4143_v3 = vld [vmem:[#allocation11_spill] sm:$0xff] }
 0x2b8   : > { %1584 = vperm.xlu0 %2590, %v3689_v62   ;;  %v3707_v56 = vpop.eup %2668 }
 0x2b9   : > { %v1167_v47 = vmul.f32 1.442695, %v1128_v43  ;;  %v1644_v55 = vpack.c.bf16 %v3703_v48, %v3707_v56  ;;  %v1171_v14 = vmul.f32 1.442695, %v1130_v35 }
 0x2bb   : > { %2670 = vpow2.f32 %v1167_v47  ;;  %v4136_v47 = vld [vmem:[#allocation8_spill] sm:$0xff] }
 0x2bc   : > { %v3699_v57 = vpop.permute.xlu2 %1484  ;;  %v1144_v62 = vsub.f32 %v4136_v47, %v1079_v52  ;;  %2672 = vpow2.f32 %v943_v40  ;;  %v4137_v52 = vld [vmem:[#allocation6_spill] sm:$0xff]  ;;  %v1603_v40 = vmul.f32 %v3586_v6, %v1411_v1 }
 0x2bd   : > { %2674 = vpow2.f32 %v939_v12 }
 0x2be   : > { %v3701_v25 = vpop.permute.xlu1 %1474  ;;  %v1199_v34 = vmul.f32 1.442695, %v1144_v62  ;;  %2676 = vpow2.f32 %v949_v42  ;;  %v892_v42 = vsub.f32 %v3453_v27, %v3461_v17 }
 0x2bf   : > { %2678 = vpow2.f32 %v1169_v54  ;;  %v1019_v54 = vpop.permute.xlu0 %1018 }
 0x2c0   : > { %2680 = vpow2.f32 %v1171_v14  ;;  %v4142_v14 = vld [vmem:[#allocation9_spill] sm:$0xff] }
 0x2c1   : > { %v3711_v58 = vpop.eup %2670  ;;  %v1707_v43 = vpop.f32.mrf.mxu1  ;;  %2682 = vpow2.f32 %v1199_v34 }
 0x2c2   : > { %v1787_v20 = vadd.f32 %v1707_v43, %v1602_v13  ;;  %v1637_v49 = vpack.c.bf16 %v3711_v58, %v3697_v0  ;;  %v945_v43 = vmul.f32 1.442695, %v889_v46  ;;  %v1132_v46 = vsub.f32 %v4143_v3, %v1019_v54 }
 0x2c4   : > { %1819 = vst.msk [vmem:[#allocation4] sm:$0xff] %vm575_vm2, %v1787_v20  ;;  %1721 = vmatmul.bf16.gmra.mxu1 %v1637_v49  ;;  %1756 = vmatmul.bf16.gmra.mxu3 %v1644_v55  ;;  %v1084_v2 = vpop.permute.xlu2 %1083  ;;  %v3725_v20 = vpop.eup %2672 }
 0x2c5   : > { %4139 = vst [vmem:[#allocation27_spill] sm:$0xff] %v3725_v20  ;;  %v3728_v12 = vpop.eup %2674 }
 0x2c6   : > { %v1074_v18 = vpop.permute.xlu1 %1073  ;;  %4140 = vst [vmem:[#allocation5_spill] sm:$0xff] %v3728_v12  ;;  %v3731_v59 = vpop.eup %2676 }
 0x2c7   : > { %v1143_v13 = vsub.f32 %v4137_v52, %v1074_v18  ;;  %1118 = vperm.xlu1 %2591, %v3602_v29   ;;  %4141 = vst [vmem:[#allocation7_spill] sm:$0xff] %v3731_v59  ;;  %v3733_v6 = vpop.eup %2678 }
 0x2c8   : > { %v3735_v49 = vpop.eup %2680 }
 0x2c9   : > { %v1197_v10 = vmul.f32 1.442695, %v1143_v13  ;;  %v1709_v35 = vpop.f32.mrf.mxu1  ;;  %v3738_v55 = vpop.eup %2682  ;;  %v1638_v52 = vpack.c.bf16 %v3735_v49, %v3733_v6 }
 0x2ca   : > { %v1788_v62 = vadd.f32 %v1709_v35, %v1603_v40  ;;  %1559 = vperm.xlu2 %2589, %v3725_v20   ;;  %v951_v40 = vmul.f32 1.442695, %v892_v42  ;;  %v1175_v35 = vmul.f32 1.442695, %v1132_v46 }
 0x2cb   : > { %2684 = vpow2.f32 %v1197_v10 }
 0x2cc   : > { %1820 = vst.msk [vmem:[#allocation4 + $0x8] sm:$0xff] %vm575_vm2, %v1788_v62  ;;  %2686 = vpow2.f32 %v945_v43  ;;  %v1024_v18 = vpop.permute.xlu2 %1023  ;;  %v4145_v62 = vld [vmem:[#allocation10_spill] sm:$0xff] }
 0x2cd   : > { %2688 = vpow2.f32 %v951_v40  ;;  %v1145_v43 = vsub.f32 %v4145_v62, %v1084_v2  ;;  %v4148_v2 = vld [vmem:[#allocation13_spill] sm:$0xff] }
 0x2ce   : > { %v1014_v47 = vpop.permute.xlu1 %1013 }
 0x2cf   : > { %1549 = vperm.xlu1 %2591, %v3728_v12   ;;  %v1131_v34 = vsub.f32 %v4142_v14, %v1014_v47  ;;  %v3757_v47 = vpop.permute.xlu0 %1494  ;;  %v1201_v54 = vmul.f32 1.442695, %v1145_v43 }
 0x2d1   : > { %v3742_v1 = vpop.eup %2684  ;;  %v1173_v27 = vmul.f32 1.442695, %v1131_v34 }
 0x2d2   : > { %1574 = vperm.xlu2 %2589, %v3731_v59   ;;  %v1645_v13 = vpack.c.bf16 %v3738_v55, %v3742_v1  ;;  %v3751_v17 = vpop.eup %2686 }
 0x2d3   : > { %4144 = vst [vmem:[#allocation8_spill] sm:$0xff] %v3751_v17  ;;  %2690 = vpow2.f32 %v1173_v27  ;;  %v3761_v42 = vpop.eup %2688  ;;  %v1133_v27 = vsub.f32 %v4148_v2, %v1024_v18  ;;  %v4151_v2 = vld [vmem:[#allocation14_spill] sm:$0xff] }
 0x2d4   : > { %1726 = vmatmul.bf16.gmra.mxu1 %v1638_v52  ;;  %1761 = vmatmul.bf16.gmra.mxu3 %v1645_v13  ;;  %2692 = vpow2.f32 %v1175_v35  ;;  %v3759_v14 = vpop.permute.xlu2 %1499  ;;  %4146 = vst [vmem:[#allocation6_spill] sm:$0xff] %v3761_v42  ;;  %v4147_v13 = vld [vmem:[#allocation12_spill] sm:$0xff] }
 0x2d5   : > { %2694 = vpow2.f32 %v1201_v54  ;;  %v1177_v43 = vmul.f32 1.442695, %v1133_v27 }
 0x2d6   : > { %v3753_v10 = vpop.permute.xlu1 %1489 }
 0x2d7   : > { %1564 = vperm.xlu1 %2591, %v3751_v17   ;;  %v1094_v62 = vpop.permute.xlu0 %1093 }
 0x2d9   : > { %v3763_v52 = vpop.eup %2690 }
 0x2da   : > { %v3767_v46 = vpop.eup %2692 }
 0x2db   : > { %v1639_v35 = vpack.c.bf16 %v3767_v46, %v3763_v52 }
 0x2dc   : > { %v1099_v59 = vpop.permute.xlu2 %1098 }
 0x2de   : > { %v1089_v34 = vpop.permute.xlu1 %1088 }
 0x2df   : > { %v1146_v3 = vsub.f32 %v4147_v13, %v1089_v34  ;;  %1579 = vperm.xlu1 %2591, %v3761_v42   ;;  %v4149_v34 = vld [vmem:[#allocation15_spill] sm:$0xff]  ;;  %v3774_v42 = vpop.eup %2694 }
 0x2e1   : > { %v1203_v40 = vmul.f32 1.442695, %v1146_v3  ;;  %v4150_v3 = vld [vmem:[#allocation16_spill] sm:$0xff] }
 0x2e2   : > { %1313 = vadd.xlane.f32.xlu0 %v3622_v19  ;;  %v1148_v54 = vsub.f32 %v4150_v3, %v1099_v59 }
 0x2e3   : > { %2696 = vpow2.f32 %v1203_v40  ;;  %v1147_v40 = vsub.f32 %v4151_v2, %v1094_v62  ;;  %v4153_v2 = vld [vmem:[#allocation19_spill] sm:$0xff] }
 0x2e4   : > { %1731 = vmatmul.bf16.gmra.mxu1 %v1639_v35  ;;  %2698 = vpow2.f32 %v1177_v43  ;;  %v1207_v27 = vmul.f32 1.442695, %v1148_v54  ;;  %v3780_v35 = vpop.permute.xlu0 %1509 }
 0x2e6   : > { %v1029_v20 = vpop.permute.xlu1 %1028 }
 0x2e7   : > { %v1134_v13 = vsub.f32 %v4149_v34, %v1029_v20  ;;  %v1205_v20 = vmul.f32 1.442695, %v1147_v40 }
 0x2e9   : > { %v2697_v17 = vpop.eup %2696  ;;  %v1179_v12 = vmul.f32 1.442695, %v1134_v13  ;;  %v4152_v13 = vld [vmem:[#allocation17_spill] sm:$0xff] }
 0x2ea   : > { %1289 = vadd.xlane.f32.xlu0 %v3655_v22  ;;  %v1646_v18 = vpack.c.bf16 %v2697_v17, %v3774_v42  ;;  %v3784_v34 = vpop.eup %2698 }
 0x2eb   : > { %2700 = vpow2.f32 %v1179_v12 }
 0x2ec   : > { %1766 = vmatmul.bf16.gmra.mxu3 %v1646_v18  ;;  %2702 = vpow2.f32 %v1207_v27  ;;  %v1109_v12 = vpop.permute.xlu0 %1108  ;;  %v1412_v18 = vld [vmem:[#allocation4 + $0x10] sm:$0xff] }
 0x2ed   : > { %2704 = vpow2.f32 %v1205_v20  ;;  %v1604_v27 = vmul.f32 %v3595_v26, %v1412_v18  ;;  %v4154_v26 = vld [vmem:[#allocation18_spill] sm:$0xff] }
 0x2ee   : > { %v3782_v53 = vpop.permute.xlu1 %1504 }
 0x2f1   : > { %v2701_v23 = vpop.eup %2700 }
 0x2f2   : > { %1319 = vadd.xlane.f32.xlu0 %v3680_v37  ;;  %v1640_v22 = vpack.c.bf16 %v2701_v23, %v3784_v34  ;;  %v3788_v62 = vpop.eup %2702  ;;  %v1150_v37 = vsub.f32 %v4153_v2, %v1109_v12 }
 0x2f3   : > { %v3790_v43 = vpop.eup %2704 }
 0x2f4   : > { %1736 = vmatmul.bf16.gmra.mxu1 %v1640_v22  ;;  %v1647_v54 = vpack.c.bf16 %v3788_v62, %v3790_v43  ;;  %v1211_v20 = vmul.f32 1.442695, %v1150_v37 }
 0x2f6   : > { %v1104_v59 = vpop.permute.xlu1 %1103 }
 0x2f7   : > { %v1149_v3 = vsub.f32 %v4152_v13, %v1104_v59  ;;  %v1413_v59 = vld [vmem:[#allocation4 + $0x18] sm:$0xff] }
 0x2f8   : > { %v1605_v12 = vmul.f32 %v3635_v39, %v1413_v59  ;;  %v4155_v39 = vpack.c.bf16 %v3624_v41, %v3622_v19  ;;  %v4158_v59 = vld [vmem:[#allocation20_spill] sm:$0xff] }
 0x2f9   : > { %v1209_v40 = vmul.f32 1.442695, %v1149_v3 }
 0x2fa   : > { %1295 = vadd.xlane.f32.xlu0 %v3711_v58  ;;  %v1641_v58 = vpack.c.bf16 %v3674_v28, %v3667_v63  ;;  %v1218_v28 = vld [vmem:[#allocation3 + $0x8] sm:$0xff] }
 0x2fb   : > { %1287 = vadd.xlane.f32.xlu2 %v3614_v5  ;;  %2706 = vpow2.f32 %v1209_v40  ;;  %v1217_v5 = vld [vmem:[#allocation3] sm:$0xff] }
 0x2fc   : > { %1771 = vmatmul.bf16.gmra.mxu3 %v1647_v54  ;;  %2708 = vpow2.f32 %v1211_v20  ;;  %v1249_v13 = vmul.f32 %v4154_v26, %v1217_v5 }
 0x2ff   : > { %v1712_v22 = vpop.f32.mrf.mxu1 }
 0x300   : > { %v1789_v7 = vadd.f32 %v1712_v22, %v1604_v27 }
 0x301   : > { %v2707_v3 = vpop.eup %2706 }
 0x302   : > { %1821 = vst.msk [vmem:[#allocation4 + $0x10] sm:$0xff] %vm575_vm2, %v1789_v7  ;;  %1325 = vadd.xlane.f32.xlu0 %v3742_v1  ;;  %v3806_v37 = vpop.eup %2708 }
 0x303   : > { %1317 = vadd.xlane.f32.xlu2 %v3676_v51  ;;  %v1648_v63 = vpack.c.bf16 %v3806_v37, %v2707_v3  ;;  %v4156_v51 = vld [vmem:[#allocation25_spill] sm:$0xff] }
 0x304   : > { %1741 = vmatmul.bf16.gmra.mxu1 %v1641_v58  ;;  %v1250_v1 = vmul.f32 %v4156_v51, %v1218_v28 }
 0x307   : > { %v1282_v54 = vpop.xlane.xlu0 %1281  ;;  %v1714_v18 = vpop.f32.mrf.mxu1 }
 0x308   : > { %v1345_v2 = vadd.f32 %v1282_v54, %v1249_v13  ;;  %v1790_v7 = vadd.f32 %v1714_v18, %v1605_v12  ;;  %v1428_v13 = vld [vmem:[#allocation4 + $0x90] sm:$0xff] }
 0x309   : > { %1285 = vadd.xlane.f32.xlu1 %v3612_v11  ;;  %v1114_v11 = vpop.permute.xlu2 %1113 }
 0x30a   : > { %1378 = vst.msk [vmem:[#allocation3] sm:$0xff] %vm1377_vm3, %v1345_v2  ;;  %1301 = vadd.xlane.f32.xlu0 %v3763_v52  ;;  %v1231_v52 = vld [vmem:[#allocation3 + $0x70] sm:$0xff]  ;;  %v1151_v5 = vsub.f32 %v4158_v59, %v1114_v11  ;;  %v1233_v59 = vld [vmem:[#allocation3 + $0x80] sm:$0xff] }
 0x30b   : > { %1822 = vst.msk [vmem:[#allocation4 + $0x18] sm:$0xff] %vm575_vm2, %v1790_v7  ;;  %1293 = vadd.xlane.f32.xlu2 %v3697_v0  ;;  %v1429_v7 = vld [vmem:[#allocation4 + $0x98] sm:$0xff] }
 0x30c   : > { %1776 = vmatmul.bf16.gmra.mxu3 %v1648_v63  ;;  %v1213_v12 = vmul.f32 1.442695, %v1151_v5  ;;  %v1432_v5 = vld [vmem:[#allocation4 + $0xb0] sm:$0xff] }
 0x30e   : > { %2710 = vpow2.f32 %v1213_v12  ;;  %v1419_v12 = vld [vmem:[#allocation4 + $0x48] sm:$0xff] }
 0x311   : > { %1315 = vadd.xlane.f32.xlu1 %v3624_v41  ;;  %v1232_v41 = vld [vmem:[#allocation3 + $0x78] sm:$0xff] }
 0x312   : > { %1331 = vadd.xlane.f32.xlu0 %v2697_v17  ;;  %v4157_v17 = vld [vmem:[#allocation21_spill] sm:$0xff] }
 0x313   : > { %1323 = vadd.xlane.f32.xlu2 %v3703_v48  ;;  %v1263_v48 = vmul.f32 %v4157_v17, %v1231_v52 }
 0x314   : > { %1746 = vmatmul.bf16.gmra.mxu1 %v4155_v39  ;;  %v1621_v39 = vmul.f32 %v3649_v61, %v1429_v7  ;;  %v1433_v7 = vld [vmem:[#allocation4 + $0xb8] sm:$0xff] }
 0x319   : > { %1291 = vadd.xlane.f32.xlu1 %v3658_v36  ;;  %v1414_v36 = vld [vmem:[#allocation4 + $0x20] sm:$0xff] }
 0x31a   : > { %1307 = vadd.xlane.f32.xlu0 %v2701_v23  ;;  %v1264_v23 = vmul.f32 %v3456_v31, %v1232_v41  ;;  %v1606_v22 = vmul.f32 %v3630_v60, %v1414_v36  ;;  %v1555_v54 = vpop.permute.xlu0 %1554 }
 0x31b   : > { %1299 = vadd.xlane.f32.xlu2 %v3735_v49 }
 0x31d   : > { %v1284_v0 = vpop.xlane.xlu2 %1283 }
 0x31e   : > { %v1346_v40 = vadd.f32 %v1284_v0, %v1250_v1  ;;  %v1430_v1 = vld [vmem:[#allocation4 + $0xa0] sm:$0xff] }
 0x31f   : > { %v1622_v17 = vmul.f32 %v3665_v45, %v1430_v1 }
 0x320   : > { %1379 = vst.msk [vmem:[#allocation3 + $0x8] sm:$0xff] %vm1377_vm3, %v1346_v40  ;;  %v1417_v40 = vld [vmem:[#allocation4 + $0x38] sm:$0xff] }
 0x321   : > { %1321 = vadd.xlane.f32.xlu1 %v3707_v56  ;;  %v1310_v19 = vpop.xlane.xlu1 %1309 }
 0x322   : > { %v1359_v27 = vadd.f32 %v1310_v19, %v1263_v48  ;;  %1337 = vadd.xlane.f32.xlu0 %v2707_v3  ;;  %v3846_v0 = vpop.permute.xlu0 %1569  ;;  %v1609_v19 = vmul.f32 %v3687_v44, %v1417_v40 }
 0x323   : > { %1329 = vadd.xlane.f32.xlu2 %v3774_v42  ;;  %v1415_v42 = vld [vmem:[#allocation4 + $0x28] sm:$0xff] }
 0x324   : > { %1392 = vst.msk [vmem:[#allocation3 + $0x70] sm:$0xff] %vm1377_vm3, %v1359_v27  ;;  %v1607_v31 = vmul.f32 %v3640_v15, %v1415_v42  ;;  %v2711_v15 = vpop.eup %2710  ;;  %v4161_v42 = vld [vmem:[#allocation26_spill] sm:$0xff] }
 0x325   : > { %v1312_v49 = vpop.xlane.xlu2 %1311 }
 0x326   : > { %v1360_v20 = vadd.f32 %v1312_v49, %v1264_v23  ;;  %v896_v23 = vsub.f32 %v3598_v16, %v3602_v29  ;;  %v1431_v49 = vld [vmem:[#allocation4 + $0xa8] sm:$0xff] }
 0x328   : > { %1393 = vst.msk [vmem:[#allocation3 + $0x78] sm:$0xff] %vm1377_vm3, %v1360_v20  ;;  %v1418_v20 = vld [vmem:[#allocation4 + $0x40] sm:$0xff] }
 0x329   : > { %1297 = vadd.xlane.f32.xlu1 %v3733_v6  ;;  %v1717_v56 = vpop.f32.mrf.mxu1  ;;  %v1620_v6 = vmul.f32 %v3672_v4, %v1428_v13  ;;  %v4162_v13 = vsub.f32 %v3564_v8, %v3573_v30  ;;  %v4163_v8 = vld [vmem:[#allocation28_spill] sm:$0xff] }
 0x32a   : > { %v1791_v58 = vadd.f32 %v1717_v56, %v1606_v22 }
 0x32b   : > { %1305 = vadd.xlane.f32.xlu2 %v3784_v34 }
 0x32c   : > { %1823 = vst.msk [vmem:[#allocation4 + $0x20] sm:$0xff] %vm575_vm2, %v1791_v58 }
 0x331   : > { %1327 = vadd.xlane.f32.xlu1 %v3738_v55  ;;  %v1719_v26 = vpop.f32.mrf.mxu1  ;;  %v4159_v55 = vld [vmem:[#allocation24_spill] sm:$0xff] }
 0x332   : > { %v1792_v60 = vadd.f32 %v1719_v26, %v1607_v31  ;;  %v1265_v31 = vmul.f32 %v4161_v42, %v1233_v59  ;;  %v1239_v42 = vld [vmem:[#allocation3 + $0xb0] sm:$0xff] }
 0x333   : > { %1335 = vadd.xlane.f32.xlu2 %v3788_v62  ;;  %v1416_v62 = vld [vmem:[#allocation4 + $0x30] sm:$0xff] }
 0x334   : > { %1824 = vst.msk [vmem:[#allocation4 + $0x28] sm:$0xff] %vm575_vm2, %v1792_v60  ;;  %v1608_v4 = vmul.f32 %v3701_v25, %v1416_v62  ;;  %v4160_v25 = vsub.f32 %v3541_v24, %v3549_v32  ;;  %v3859_v24 = vpop.permute.xlu0 %1584  ;;  %v959_v32 = vmul.f32 1.442695, %v896_v23  ;;  %v1624_v60 = vmul.f32 %v1555_v54, %v1432_v5  ;;  %v1420_v62 = vld [vmem:[#allocation4 + $0x50] sm:$0xff] }
 0x337   : > { %v1752_v34 = vpop.f32.mrf.mxu3 }
 0x338   : > { %v1805_v3 = vadd.f32 %v1752_v34, %v1620_v6  ;;  %v957_v6 = vmul.f32 1.442695, %v4162_v13 }
 0x339   : > { %1303 = vadd.xlane.f32.xlu1 %v3767_v46  ;;  %v1119_v18 = vpop.permute.xlu1 %1118 }
 0x33a   : > { %1837 = vst.msk [vmem:[#allocation4 + $0x90] sm:$0xff] %vm575_vm2, %v1805_v3  ;;  %v1152_v2 = vsub.f32 %v4159_v55, %v1119_v18  ;;  %v1611_v18 = vmul.f32 %v3753_v10, %v1419_v12  ;;  %v1435_v12 = vld [vmem:[#allocation4 + $0xc8] sm:$0xff] }
 0x33b   : > { %1341 = vadd.xlane.f32.xlu2 %v2711_v15 }
 0x33c   : > { %v1215_v63 = vmul.f32 1.442695, %v1152_v2  ;;  %v1221_v2 = vld [vmem:[#allocation3 + $0x20] sm:$0xff] }
 0x33d   : > { %v1253_v30 = vmul.f32 %v4163_v8, %v1221_v2 }
 0x33e   : > { %2712 = vpow2.f32 %v1215_v63  ;;  %v1560_v63 = vpop.permute.xlu2 %1559 }
 0x33f   : > { %v1754_v11 = vpop.f32.mrf.mxu3  ;;  %v1625_v10 = vmul.f32 %v1560_v63, %v1433_v7  ;;  %v1219_v7 = vld [vmem:[#allocation3 + $0x10] sm:$0xff] }
 0x340   : > { %v1806_v28 = vadd.f32 %v1754_v11, %v1621_v39 }
 0x341   : > { %1333 = vadd.xlane.f32.xlu1 %v3790_v43  ;;  %v1722_v46 = vpop.f32.mrf.mxu1  ;;  %v955_v43 = vmul.f32 1.442695, %v4160_v25  ;;  %v1550_v45 = vpop.permute.xlu1 %1549 }
 0x342   : > { %1838 = vst.msk [vmem:[#allocation4 + $0x98] sm:$0xff] %vm575_vm2, %v1806_v28  ;;  %v1793_v51 = vadd.f32 %v1722_v46, %v1608_v4  ;;  %v1623_v44 = vmul.f32 %v1550_v45, %v1431_v49  ;;  %v1612_v28 = vmul.f32 %v3757_v47, %v1420_v62  ;;  %v1434_v49 = vld [vmem:[#allocation4 + $0xc0] sm:$0xff] }
 0x343   : > { %2714 = vpow2.f32 %v955_v43 }
 0x344   : > { %v2713_v52 = vpop.eup %2712  ;;  %1825 = vst.msk [vmem:[#allocation4 + $0x30] sm:$0xff] %vm575_vm2, %v1793_v51  ;;  %2716 = vpow2.f32 %v959_v32  ;;  %v4164_v32 = vld [vmem:[#allocation29_spill] sm:$0xff] }
 0x345   : > { %1343 = vadd.xlane.f32.xlu0 %v2713_v52  ;;  %v1649_v61 = vpack.c.bf16 %v2713_v52, %v2711_v15  ;;  %2718 = vpow2.f32 %v957_v6  ;;  %v1236_v52 = vld [vmem:[#allocation3 + $0x98] sm:$0xff]  ;;  %v1627_v6 = vmul.f32 %v3846_v0, %v1435_v12  ;;  %v4165_v0 = vld [vmem:[#allocation22_spill] sm:$0xff] }
 0x346   : > { %v1575_v25 = vpop.permute.xlu2 %1574  ;;  %v1251_v62 = vmul.f32 %v4165_v0, %v1219_v7  ;;  %v1222_v12 = vld [vmem:[#allocation3 + $0x28] sm:$0xff] }
 0x347   : > { %v1757_v48 = vpop.f32.mrf.mxu3  ;;  %1781 = vmatmul.bf16.gmra.mxu3 %v1649_v61  ;;  %v1268_v61 = vmul.f32 %v3485_v50, %v1236_v52 }
 0x348   : > { %v1807_v41 = vadd.f32 %v1757_v48, %v1622_v17  ;;  %v1421_v17 = vld [vmem:[#allocation4 + $0x58] sm:$0xff] }
 0x349   : > { %1339 = vadd.xlane.f32.xlu1 %v3806_v37  ;;  %v1724_v27 = vpop.f32.mrf.mxu1  ;;  %v1610_v37 = vmul.f32 %v3699_v57, %v1418_v20  ;;  %v3862_v29 = vpop.eup %2714  ;;  %v1613_v43 = vmul.f32 %v3759_v14, %v1421_v17  ;;  %v1422_v20 = vld [vmem:[#allocation4 + $0x60] sm:$0xff] }
 0x34a   : > { %1839 = vst.msk [vmem:[#allocation4 + $0xa0] sm:$0xff] %vm575_vm2, %v1807_v41  ;;  %v1794_v36 = vadd.f32 %v1724_v27, %v1609_v19  ;;  %v3871_v3 = vpop.eup %2716  ;;  %v1224_v41 = vld [vmem:[#allocation3 + $0x38] sm:$0xff]  ;;  %v1565_v27 = vpop.permute.xlu1 %1564  ;;  %v1614_v59 = vmul.f32 %v3782_v53, %v1422_v20  ;;  %v4169_v20 = vld [vmem:[#allocation43_spill] sm:$0xff] }
 0x34b   : > { %v3881_v51 = vpop.eup %2718  ;;  %v1256_v45 = vmul.f32 %v3505_v9, %v1224_v41  ;;  %v1242_v41 = vld [vmem:[#allocation3 + $0xc8] sm:$0xff] }
 0x34c   : > { %1826 = vst.msk [vmem:[#allocation4 + $0x38] sm:$0xff] %vm575_vm2, %v1794_v36  ;;  %v1220_v36 = vld [vmem:[#allocation3 + $0x18] sm:$0xff] }
 0x34f   : > { %v1759_v22 = vpop.f32.mrf.mxu3 }
 0x350   : > { %v1808_v56 = vadd.f32 %v1759_v22, %v1623_v44  ;;  %v1252_v44 = vmul.f32 %v4164_v32, %v1220_v36  ;;  %v1626_v22 = vmul.f32 %v1565_v27, %v1434_v49  ;;  %v4168_v36 = vld [vmem:[#allocation30_spill] sm:$0xff]  ;;  %v1425_v32 = vld [vmem:[#allocation4 + $0x78] sm:$0xff] }
 0x351   : > { %v1727_v58 = vpop.f32.mrf.mxu1 }
 0x352   : > { %1840 = vst.msk [vmem:[#allocation4 + $0xa8] sm:$0xff] %vm575_vm2, %v1808_v56  ;;  %v1795_v16 = vadd.f32 %v1727_v58, %v1610_v37 }
 0x353   : > { %1589 = vperm.xlu2 %2589, %v3862_v29  }
 0x354   : > { %1827 = vst.msk [vmem:[#allocation4 + $0x40] sm:$0xff] %vm575_vm2, %v1795_v16 }
 0x355   : > { %v1314_v26 = vpop.xlane.xlu0 %1313 }
 0x356   : > { %v1361_v57 = vadd.f32 %v1314_v26, %v1265_v31  ;;  %v1235_v31 = vld [vmem:[#allocation3 + $0x90] sm:$0xff]  ;;  %v1580_v26 = vpop.permute.xlu1 %1579 }
 0x357   : > { %v1762_v34 = vpop.f32.mrf.mxu3  ;;  %v1267_v53 = vmul.f32 %v3509_v33, %v1235_v31  ;;  %v1223_v33 = vld [vmem:[#allocation3 + $0x30] sm:$0xff] }
 0x358   : > { %1394 = vst.msk [vmem:[#allocation3 + $0x80] sm:$0xff] %vm1377_vm3, %v1361_v57  ;;  %v1809_v15 = vadd.f32 %v1762_v34, %v1624_v60  ;;  %v1271_v60 = vmul.f32 %v3652_v38, %v1239_v42  ;;  %v1423_v57 = vld [vmem:[#allocation4 + $0x68] sm:$0xff]  ;;  %v1227_v38 = vld [vmem:[#allocation3 + $0x50] sm:$0xff] }
 0x359   : > { %v1729_v55 = vpop.f32.mrf.mxu1  ;;  %1599 = vperm.xlu0 %2590, %v3871_v3   ;;  %v1615_v2 = vmul.f32 %v3780_v35, %v1423_v57  ;;  %v1259_v35 = vmul.f32 %v3537_v21, %v1227_v38  ;;  %v4171_v42 = vld [vmem:[#allocation42_spill] sm:$0xff] }
 0x35a   : > { %1841 = vst.msk [vmem:[#allocation4 + $0xb0] sm:$0xff] %vm575_vm2, %v1809_v15  ;;  %v1796_v54 = vadd.f32 %v1729_v55, %v1611_v18  ;;  %v1230_v57 = vld [vmem:[#allocation3 + $0x68] sm:$0xff] }
 0x35c   : > { %1828 = vst.msk [vmem:[#allocation4 + $0x48] sm:$0xff] %vm575_vm2, %v1796_v54 }
 0x35d   : > { %v1290_v39 = vpop.xlane.xlu0 %1289 }
 0x35e   : > { %v1349_v11 = vadd.f32 %v1290_v39, %v1253_v30  ;;  %v1436_v30 = vld [vmem:[#allocation4 + $0xd0] sm:$0xff] }
 0x35f   : > { %v1764_v4 = vpop.f32.mrf.mxu3 }
 0x360   : > { %1382 = vst.msk [vmem:[#allocation3 + $0x20] sm:$0xff] %vm1377_vm3, %v1349_v11  ;;  %v1810_v46 = vadd.f32 %v1764_v4, %v1625_v10  ;;  %v1424_v10 = vld [vmem:[#allocation4 + $0x70] sm:$0xff] }
 0x361   : > { %v1732_v1 = vpop.f32.mrf.mxu1 }
 0x362   : > { %1842 = vst.msk [vmem:[#allocation4 + $0xb8] sm:$0xff] %vm575_vm2, %v1810_v46  ;;  %v1797_v40 = vadd.f32 %v1732_v1, %v1612_v28  ;;  %1594 = vperm.xlu1 %2591, %v3881_v51   ;;  %v4166_v28 = vld [vmem:[#allocation33_spill] sm:$0xff]  ;;  %v1628_v1 = vmul.f32 %v1575_v25, %v1436_v30  ;;  %v1238_v25 = vld [vmem:[#allocation3 + $0xa8] sm:$0xff] }
 0x363   : > { %v1255_v46 = vmul.f32 %v4166_v28, %v1223_v33  ;;  %v1245_v28 = vld [vmem:[#allocation3 + $0xe0] sm:$0xff] }
 0x364   : > { %1829 = vst.msk [vmem:[#allocation4 + $0x50] sm:$0xff] %vm575_vm2, %v1797_v40 }
 0x365   : > { %v1320_v48 = vpop.xlane.xlu0 %1319 }
 0x366   : > { %v1364_v47 = vadd.f32 %v1320_v48, %v1268_v61  ;;  %v4167_v48 = vld [vmem:[#allocation37_spill] sm:$0xff] }
 0x368   : > { %1397 = vst.msk [vmem:[#allocation3 + $0x98] sm:$0xff] %vm1377_vm3, %v1364_v47  ;;  %v1616_v47 = vmul.f32 %v4167_v48, %v1424_v10  ;;  %v1427_v48 = vld [vmem:[#allocation4 + $0x88] sm:$0xff] }
 0x369   : > { %v1734_v19 = vpop.f32.mrf.mxu1 }
 0x36a   : > { %v1798_v23 = vadd.f32 %v1734_v19, %v1613_v43  ;;  %v1234_v19 = vld [vmem:[#allocation3 + $0x88] sm:$0xff] }
 0x36b   : > { %v1266_v49 = vmul.f32 %v4168_v36, %v1234_v19  ;;  %v4178_v19 = vld [vmem:[#allocation8_spill] sm:$0xff] }
 0x36c   : > { %1830 = vst.msk [vmem:[#allocation4 + $0x58] sm:$0xff] %vm575_vm2, %v1798_v23  ;;  %v1437_v23 = vld [vmem:[#allocation4 + $0xd8] sm:$0xff] }
 0x36d   : > { %v1296_v50 = vpop.xlane.xlu0 %1295 }
 0x36e   : > { %v1352_v37 = vadd.f32 %v1296_v50, %v1256_v45  ;;  %v1288_v56 = vpop.xlane.xlu2 %1287  ;;  %v1274_v50 = vmul.f32 %v4169_v20, %v1242_v41 }
 0x36f   : > { %v1348_v14 = vadd.f32 %v1288_v56, %v1252_v44  ;;  %v1767_v58 = vpop.f32.mrf.mxu3 }
 0x370   : > { %1385 = vst.msk [vmem:[#allocation3 + $0x38] sm:$0xff] %vm1377_vm3, %v1352_v37  ;;  %v1811_v16 = vadd.f32 %v1767_v58, %v1626_v22  ;;  %v4170_v37 = vld [vmem:[#allocation5_spill] sm:$0xff] }
 0x371   : > { %1381 = vst.msk [vmem:[#allocation3 + $0x18] sm:$0xff] %vm1377_vm3, %v1348_v14  ;;  %v1737_v5 = vpop.f32.mrf.mxu1  ;;  %v1270_v56 = vmul.f32 %v4170_v37, %v1238_v25  ;;  %v1629_v14 = vmul.f32 %v1580_v26, %v1437_v23  ;;  %v1226_v26 = vld [vmem:[#allocation3 + $0x48] sm:$0xff]  ;;  %v4179_v23 = vld [vmem:[#allocation41_spill] sm:$0xff] }
 0x372   : > { %1843 = vst.msk [vmem:[#allocation4 + $0xc0] sm:$0xff] %vm575_vm2, %v1811_v16  ;;  %v1799_v9 = vadd.f32 %v1737_v5, %v1614_v59  ;;  %v1619_v36 = vmul.f32 %v4179_v23, %v1427_v48 }
 0x374   : > { %1831 = vst.msk [vmem:[#allocation4 + $0x60] sm:$0xff] %vm575_vm2, %v1799_v9  ;;  %v1617_v9 = vmul.f32 %v4171_v42, %v1425_v32  ;;  %v4180_v32 = vld [vmem:[#allocation34_spill] sm:$0xff]  ;;  %v4182_v42 = vld [vmem:[#allocation27_spill] sm:$0xff] }
 0x375   : > { %v1326_v13 = vpop.xlane.xlu0 %1325 }
 0x376   : > { %v1367_v34 = vadd.f32 %v1326_v13, %v1271_v60  ;;  %v1318_v18 = vpop.xlane.xlu2 %1317 }
 0x377   : > { %v1363_v15 = vadd.f32 %v1318_v18, %v1267_v53  ;;  %v1769_v55 = vpop.f32.mrf.mxu3  ;;  %v1438_v53 = vld [vmem:[#allocation4 + $0xe0] sm:$0xff] }
 0x378   : > { %1400 = vst.msk [vmem:[#allocation3 + $0xb0] sm:$0xff] %vm1377_vm3, %v1367_v34  ;;  %v1812_v54 = vadd.f32 %v1769_v55, %v1627_v6  ;;  %v4172_v6 = vld [vmem:[#allocation31_spill] sm:$0xff] }
 0x379   : > { %1396 = vst.msk [vmem:[#allocation3 + $0x90] sm:$0xff] %vm1377_vm3, %v1363_v15  ;;  %v1739_v63 = vpop.f32.mrf.mxu1  ;;  %v1254_v34 = vmul.f32 %v4172_v6, %v1222_v12  ;;  %v4173_v15 = vld [vmem:[#allocation35_spill] sm:$0xff] }
 0x37a   : > { %1844 = vst.msk [vmem:[#allocation4 + $0xc8] sm:$0xff] %vm575_vm2, %v1812_v54  ;;  %v1800_v8 = vadd.f32 %v1739_v63, %v1615_v2  ;;  %v1262_v55 = vmul.f32 %v4173_v15, %v1230_v57  ;;  %v1426_v2 = vld [vmem:[#allocation4 + $0x80] sm:$0xff]  ;;  %v4174_v63 = vld [vmem:[#allocation36_spill] sm:$0xff]  ;;  %v1247_v6 = vld [vmem:[#allocation3 + $0xf0] sm:$0xff] }
 0x37b   : > { %v1258_v38 = vmul.f32 %v4174_v63, %v1226_v26  ;;  %v1243_v63 = vld [vmem:[#allocation3 + $0xd0] sm:$0xff] }
 0x37c   : > { %1832 = vst.msk [vmem:[#allocation4 + $0x68] sm:$0xff] %vm575_vm2, %v1800_v8  ;;  %v1286_v39 = vpop.xlane.xlu1 %1285  ;;  %v1630_v8 = vmul.f32 %v3859_v24, %v1438_v53  ;;  %v1241_v24 = vld [vmem:[#allocation3 + $0xc0] sm:$0xff]  ;;  %v1228_v53 = vld [vmem:[#allocation3 + $0x58] sm:$0xff] }
 0x37d   : > { %v1347_v11 = vadd.f32 %v1286_v39, %v1251_v62  ;;  %v1302_v4 = vpop.xlane.xlu0 %1301  ;;  %v4175_v39 = vld [vmem:[#allocation40_spill] sm:$0xff] }
 0x37e   : > { %v1355_v52 = vadd.f32 %v1302_v4, %v1259_v35  ;;  %v1294_v40 = vpop.xlane.xlu2 %1293  ;;  %v1618_v35 = vmul.f32 %v4175_v39, %v1426_v2  ;;  %v1279_v2 = vmul.f32 %v3881_v51, %v1247_v6 }
 0x37f   : > { %1380 = vst.msk [vmem:[#allocation3 + $0x10] sm:$0xff] %vm1377_vm3, %v1347_v11  ;;  %v1351_v61 = vadd.f32 %v1294_v40, %v1255_v46  ;;  %v1772_v17 = vpop.f32.mrf.mxu3  ;;  %v1237_v11 = vld [vmem:[#allocation3 + $0xa0] sm:$0xff] }
 0x380   : > { %1388 = vst.msk [vmem:[#allocation3 + $0x50] sm:$0xff] %vm1377_vm3, %v1355_v52  ;;  %v1813_v43 = vadd.f32 %v1772_v17, %v1628_v1  ;;  %v4176_v1 = vld [vmem:[#allocation32_spill] sm:$0xff] }
 0x381   : > { %1384 = vst.msk [vmem:[#allocation3 + $0x30] sm:$0xff] %vm1377_vm3, %v1351_v61  ;;  %v1742_v21 = vpop.f32.mrf.mxu1  ;;  %v1269_v52 = vmul.f32 %v4176_v1, %v1237_v11  ;;  %v4177_v61 = vld [vmem:[#allocation44_spill] sm:$0xff] }
 0x382   : > { %1845 = vst.msk [vmem:[#allocation4 + $0xd0] sm:$0xff] %vm575_vm2, %v1813_v43  ;;  %v1801_v27 = vadd.f32 %v1742_v21, %v1616_v47  ;;  %v1277_v17 = vmul.f32 %v4177_v61, %v1245_v28  ;;  %v1273_v21 = vmul.f32 %v4178_v19, %v1241_v24  ;;  %v1441_v61 = vld [vmem:[#allocation4 + $0xf8] sm:$0xff] }
 0x384   : > { %1833 = vst.msk [vmem:[#allocation4 + $0x70] sm:$0xff] %vm575_vm2, %v1801_v27  ;;  %v1316_v45 = vpop.xlane.xlu1 %1315 }
 0x385   : > { %v1362_v44 = vadd.f32 %v1316_v45, %v1266_v49  ;;  %v1332_v22 = vpop.xlane.xlu0 %1331  ;;  %v1225_v49 = vld [vmem:[#allocation3 + $0x40] sm:$0xff] }
 0x386   : > { %v1370_v58 = vadd.f32 %v1332_v22, %v1274_v50  ;;  %v1324_v59 = vpop.xlane.xlu2 %1323  ;;  %v1229_v50 = vld [vmem:[#allocation3 + $0x60] sm:$0xff] }
 0x387   : > { %1395 = vst.msk [vmem:[#allocation3 + $0x88] sm:$0xff] %vm1377_vm3, %v1362_v44  ;;  %v1366_v16 = vadd.f32 %v1324_v59, %v1270_v56  ;;  %v1774_v5 = vpop.f32.mrf.mxu3  ;;  %v1257_v44 = vmul.f32 %v4180_v32, %v1225_v49  ;;  %v4181_v56 = vld [vmem:[#allocation39_spill] sm:$0xff] }
 0x388   : > { %1403 = vst.msk [vmem:[#allocation3 + $0xc8] sm:$0xff] %vm1377_vm3, %v1370_v58  ;;  %v1814_v31 = vadd.f32 %v1774_v5, %v1629_v14  ;;  %v1261_v14 = vmul.f32 %v4181_v56, %v1229_v50  ;;  %v1244_v5 = vld [vmem:[#allocation3 + $0xd8] sm:$0xff] }
 0x389   : > { %1399 = vst.msk [vmem:[#allocation3 + $0xa8] sm:$0xff] %vm1377_vm3, %v1366_v16  ;;  %v1744_v60 = vpop.f32.mrf.mxu1  ;;  %v1240_v16 = vld [vmem:[#allocation3 + $0xb8] sm:$0xff] }
 0x38a   : > { %1846 = vst.msk [vmem:[#allocation4 + $0xd8] sm:$0xff] %vm575_vm2, %v1814_v31  ;;  %v1802_v13 = vadd.f32 %v1744_v60, %v1617_v9  ;;  %v1272_v9 = vmul.f32 %v4182_v42, %v1240_v16  ;;  %v4183_v60 = vld [vmem:[#allocation6_spill] sm:$0xff] }
 0x38b   : > { %v1276_v57 = vmul.f32 %v4183_v60, %v1244_v5 }
 0x38c   : > { %1834 = vst.msk [vmem:[#allocation4 + $0x78] sm:$0xff] %vm575_vm2, %v1802_v13  ;;  %v1292_v18 = vpop.xlane.xlu1 %1291 }
 0x38d   : > { %v1350_v54 = vadd.f32 %v1292_v18, %v1254_v34  ;;  %v1308_v7 = vpop.xlane.xlu0 %1307  ;;  %v4184_v34 = vld [vmem:[#allocation38_spill] sm:$0xff] }
 0x38e   : > { %v1358_v33 = vadd.f32 %v1308_v7, %v1262_v55  ;;  %v1300_v30 = vpop.xlane.xlu2 %1299  ;;  %v1260_v18 = vmul.f32 %v4184_v34, %v1228_v53 }
 0x38f   : > { %1383 = vst.msk [vmem:[#allocation3 + $0x28] sm:$0xff] %vm1377_vm3, %v1350_v54  ;;  %v1354_v0 = vadd.f32 %v1300_v30, %v1258_v38  ;;  %v1777_v62 = vpop.f32.mrf.mxu3  ;;  %v4185_v38 = vld [vmem:[#allocation7_spill] sm:$0xff]  ;;  %v1439_v30 = vld [vmem:[#allocation4 + $0xe8] sm:$0xff] }
 0x390   : > { %1391 = vst.msk [vmem:[#allocation3 + $0x68] sm:$0xff] %vm1377_vm3, %v1358_v33  ;;  %v1815_v10 = vadd.f32 %v1777_v62, %v1630_v8  ;;  %v1275_v8 = vmul.f32 %v4185_v38, %v1243_v63 }
 0x391   : > { %1387 = vst.msk [vmem:[#allocation3 + $0x48] sm:$0xff] %vm1377_vm3, %v1354_v0  ;;  %v1747_v4 = vpop.f32.mrf.mxu1  ;;  %v1248_v0 = vld [vmem:[#allocation3 + $0xf8] sm:$0xff] }
 0x392   : > { %1847 = vst.msk [vmem:[#allocation4 + $0xe0] sm:$0xff] %vm575_vm2, %v1815_v10  ;;  %v1803_v46 = vadd.f32 %v1747_v4, %v1618_v35  ;;  %v1280_v10 = vmul.f32 %v3871_v3, %v1248_v0  ;;  %v1246_v4 = vld [vmem:[#allocation3 + $0xe8] sm:$0xff] }
 0x393   : > { %v1278_v24 = vmul.f32 %v3862_v29, %v1246_v4 }
 0x394   : > { %1835 = vst.msk [vmem:[#allocation4 + $0x80] sm:$0xff] %vm575_vm2, %v1803_v46  ;;  %v1322_v40 = vpop.xlane.xlu1 %1321 }
 0x395   : > { %v1365_v47 = vadd.f32 %v1322_v40, %v1269_v52  ;;  %v1338_v43 = vpop.xlane.xlu0 %1337 }
 0x396   : > { %v1373_v41 = vadd.f32 %v1338_v43, %v1277_v17  ;;  %v1330_v27 = vpop.xlane.xlu2 %1329 }
 0x397   : > { %1398 = vst.msk [vmem:[#allocation3 + $0xa0] sm:$0xff] %vm1377_vm3, %v1365_v47  ;;  %v1369_v25 = vadd.f32 %v1330_v27, %v1273_v21  ;;  %v1779_v51 = vpop.f32.mrf.mxu3  ;;  %v1440_v47 = vld [vmem:[#allocation4 + $0xf0] sm:$0xff] }
 0x398   : > { %1406 = vst.msk [vmem:[#allocation3 + $0xe0] sm:$0xff] %vm1377_vm3, %v1373_v41 }
 0x399   : > { %1402 = vst.msk [vmem:[#allocation3 + $0xc0] sm:$0xff] %vm1377_vm3, %v1369_v25  ;;  %v1749_v45 = vpop.f32.mrf.mxu1 }
 0x39a   : > { %v1804_v20 = vadd.f32 %v1749_v45, %v1619_v36 }
 0x39c   : > { %1836 = vst.msk [vmem:[#allocation4 + $0x88] sm:$0xff] %vm575_vm2, %v1804_v20  ;;  %v1298_v22 = vpop.xlane.xlu1 %1297 }
 0x39d   : > { %v1353_v37 = vadd.f32 %v1298_v22, %v1257_v44 }
 0x39e   : > { %v1306_v58 = vpop.xlane.xlu2 %1305 }
 0x39f   : > { %1386 = vst.msk [vmem:[#allocation3 + $0x40] sm:$0xff] %vm1377_vm3, %v1353_v37  ;;  %v1357_v59 = vadd.f32 %v1306_v58, %v1261_v14 }
 0x3a1   : > { %1390 = vst.msk [vmem:[#allocation3 + $0x60] sm:$0xff] %vm1377_vm3, %v1357_v59 }
 0x3a4   : > { %v1328_v31 = vpop.xlane.xlu1 %1327 }
 0x3a5   : > { %v1368_v12 = vadd.f32 %v1328_v31, %v1272_v9 }
 0x3a6   : > { %v1336_v13 = vpop.xlane.xlu2 %1335 }
 0x3a7   : > { %1401 = vst.msk [vmem:[#allocation3 + $0xb8] sm:$0xff] %vm1377_vm3, %v1368_v12  ;;  %v1372_v26 = vadd.f32 %v1336_v13, %v1276_v57 }
 0x3a9   : > { %1405 = vst.msk [vmem:[#allocation3 + $0xd8] sm:$0xff] %vm1377_vm3, %v1372_v26 }
 0x3ac   : > { %v1304_v15 = vpop.xlane.xlu1 %1303 }
 0x3ad   : > { %v1356_v55 = vadd.f32 %v1304_v15, %v1260_v18 }
 0x3ae   : > { %v1342_v54 = vpop.xlane.xlu2 %1341 }
 0x3af   : > { %1389 = vst.msk [vmem:[#allocation3 + $0x58] sm:$0xff] %vm1377_vm3, %v1356_v55  ;;  %v1375_v7 = vadd.f32 %v1342_v54, %v1279_v2 }
 0x3b1   : > { %1408 = vst.msk [vmem:[#allocation3 + $0xf0] sm:$0xff] %vm1377_vm3, %v1375_v7 }
 0x3b4   : > { %v1334_v33 = vpop.xlane.xlu1 %1333 }
 0x3b5   : > { %v1371_v62 = vadd.f32 %v1334_v33, %v1275_v8 }
 0x3b6   : > { %v1590_v39 = vpop.permute.xlu2 %1589 }
 0x3b7   : > { %1404 = vst.msk [vmem:[#allocation3 + $0xd0] sm:$0xff] %vm1377_vm3, %v1371_v62  ;;  %v1631_v35 = vmul.f32 %v1590_v39, %v1439_v30 }
 0x3b8   : > { %v1344_v11 = vpop.xlane.xlu0 %1343 }
 0x3b9   : > { %v1816_v28 = vadd.f32 %v1779_v51, %v1631_v35  ;;  %v1376_v46 = vadd.f32 %v1344_v11, %v1280_v10 }
 0x3bb   : > { %1848 = vst.msk [vmem:[#allocation4 + $0xe8] sm:$0xff] %vm575_vm2, %v1816_v28 }
 0x3bc   : > { %1409 = vst.msk [vmem:[#allocation3 + $0xf8] sm:$0xff] %vm1377_vm3, %v1376_v46  ;;  %v1340_v1 = vpop.xlane.xlu1 %1339 }
 0x3bd   : > { %v1374_v52 = vadd.f32 %v1340_v1, %v1278_v24 }
 0x3bf   : > { %1407 = vst.msk [vmem:[#allocation3 + $0xe8] sm:$0xff] %vm1377_vm3, %v1374_v52 }
 0x3ca   : > { %v1782_v40 = vpop.f32.mrf.mxu3 }
 0x3cb   : > { %v1600_v17 = vpop.permute.xlu0 %1599 }
 0x3cc   : > { %v1633_v48 = vmul.f32 %v1600_v17, %v1441_v61 }
 0x3d2   : > { %v1784_v3 = vpop.f32.mrf.mxu3 }
 0x3d3   : > { %v1818_v43 = vadd.f32 %v1784_v3, %v1633_v48 }
 0x3d4   : > { %v1595_v19 = vpop.permute.xlu1 %1594 }
 0x3d5   : > { %1850 = vst.msk [vmem:[#allocation4 + $0xf8] sm:$0xff] %vm575_vm2, %v1818_v43  ;;  %v1632_v21 = vmul.f32 %v1595_v19, %v1440_v47  ;;  %1886 = sbr.rel (%p2494_p8) target bundleno = 1194 (0x4aa), region = 40 }
 0x3d7   : > { %v1817_v41 = vadd.f32 %v1782_v40, %v1632_v21 }
 0x3d9   : > { %1849 = vst.msk [vmem:[#allocation4 + $0xf0] sm:$0xff] %vm575_vm2, %v1817_v41 }
 0x3da   : > { %v1891_v29 = vld [vmem:[#allocation3 + $0x20] sm:$0xff]  ;;  %v1889_v27 = vld [vmem:[#allocation3 + $0x10] sm:$0xff]  ;;  %v2830_v23 = vmov 0   ;;  %v1892_v36 = vld [vmem:[#allocation3 + $0x28] sm:$0xff] }
 0x3db   : > { %v1887_v25 = vld [vmem:[#allocation3] sm:$0xff]  ;;  %2722 = vset.pattern.permute.xlu2 %v2830_v23  ;;  %2721 = vset.pattern.permute.xlu1 %v2830_v23  ;;  %2723 = vrcp.f32 %v1891_v29  ;;  %v1890_v49 = vld [vmem:[#allocation3 + $0x18] sm:$0xff]  ;;  %v1888_v45 = vld [vmem:[#allocation3 + $0x8] sm:$0xff] }
 0x3dc   : > { %2720 = vset.pattern.permute.xlu0 %v2830_v23  ;;  %2725 = vrcp.f32 %v1889_v27  ;;  %v1895_v44 = vld [vmem:[#allocation3 + $0x40] sm:$0xff]  ;;  %v1894_v37 = vld [vmem:[#allocation3 + $0x38] sm:$0xff]  ;;  %v1893_v14 = vld [vmem:[#allocation3 + $0x30] sm:$0xff] }
 0x3dd   : > { %2727 = vrcp.f32 %v1887_v25  ;;  %v1898_v59 = vld [vmem:[#allocation3 + $0x58] sm:$0xff]  ;;  %v1897_v5 = vld [vmem:[#allocation3 + $0x50] sm:$0xff]  ;;  %v1896_v9 = vld [vmem:[#allocation3 + $0x48] sm:$0xff] }
 0x3de   : > { %2729 = vrcp.f32 %v1892_v36  ;;  %v1901_v12 = vld [vmem:[#allocation3 + $0x70] sm:$0xff]  ;;  %v1900_v57 = vld [vmem:[#allocation3 + $0x68] sm:$0xff]  ;;  %v1899_v26 = vld [vmem:[#allocation3 + $0x60] sm:$0xff] }
 0x3df   : > { %2731 = vrcp.f32 %v1890_v49  ;;  %v1904_v6 = vld [vmem:[#allocation3 + $0x88] sm:$0xff]  ;;  %v1903_v18 = vld [vmem:[#allocation3 + $0x80] sm:$0xff]  ;;  %v1902_v55 = vld [vmem:[#allocation3 + $0x78] sm:$0xff] }
 0x3e0   : > { %2733 = vrcp.f32 %v1888_v45  ;;  %v1907_v54 = vld [vmem:[#allocation3 + $0xa0] sm:$0xff]  ;;  %v1906_v63 = vld [vmem:[#allocation3 + $0x98] sm:$0xff]  ;;  %v1905_v8 = vld [vmem:[#allocation3 + $0x90] sm:$0xff] }
 0x3e1   : > { %v2724_v20 = vpop.eup %2723  ;;  %2735 = vrcp.f32 %v1895_v44  ;;  %v1910_v30 = vld [vmem:[#allocation3 + $0xb8] sm:$0xff]  ;;  %v1909_v62 = vld [vmem:[#allocation3 + $0xb0] sm:$0xff]  ;;  %v1908_v35 = vld [vmem:[#allocation3 + $0xa8] sm:$0xff] }
 0x3e2   : > { %v2726_v50 = vpop.eup %2725  ;;  %2005 = vperm.xlu2 %2722, %v2724_v20   ;;  %2737 = vrcp.f32 %v1894_v37  ;;  %v1913_v51 = vld [vmem:[#allocation3 + $0xd0] sm:$0xff]  ;;  %v1912_v4 = vld [vmem:[#allocation3 + $0xc8] sm:$0xff]  ;;  %v1911_v46 = vld [vmem:[#allocation3 + $0xc0] sm:$0xff] }
 0x3e3   : > { %v2728_v32 = vpop.eup %2727  ;;  %1995 = vperm.xlu1 %2721, %v2726_v50   ;;  %2739 = vrcp.f32 %v1893_v14  ;;  %v1916_v1 = vld [vmem:[#allocation3 + $0xe8] sm:$0xff]  ;;  %v1915_v40 = vld [vmem:[#allocation3 + $0xe0] sm:$0xff]  ;;  %v1914_v17 = vld [vmem:[#allocation3 + $0xd8] sm:$0xff] }
 0x3e4   : > { %1985 = vperm.xlu0 %2720, %v2728_v32   ;;  %v2730_v22 = vpop.eup %2729  ;;  %2741 = vrcp.f32 %v1898_v59  ;;  %v1918_v47 = vld [vmem:[#allocation3 + $0xf8] sm:$0xff]  ;;  %v1917_v19 = vld [vmem:[#allocation3 + $0xf0] sm:$0xff]  ;;  %v1955_v27 = vld [vmem:[#allocation4 + $0x20] sm:$0xff] }
 0x3e5   : > { %v2732_v56 = vpop.eup %2731  ;;  %2743 = vrcp.f32 %v1897_v5  ;;  %v1956_v36 = vld [vmem:[#allocation4 + $0x28] sm:$0xff]  ;;  %v1959_v20 = vld [vmem:[#allocation4 + $0x40] sm:$0xff]  ;;  %v1962_v44 = vld [vmem:[#allocation4 + $0x58] sm:$0xff] }
 0x3e6   : > { %v2734_v58 = vpop.eup %2733  ;;  %2745 = vrcp.f32 %v1896_v9  ;;  %v1954_v9 = vld [vmem:[#allocation4 + $0x18] sm:$0xff] }
 0x3e7   : > { %v2736_v16 = vpop.eup %2735  ;;  %2747 = vrcp.f32 %v1901_v12  ;;  %v1952_v12 = vld [vmem:[#allocation4 + $0x8] sm:$0xff] }
 0x3e8   : > { %v2738_v42 = vpop.eup %2737  ;;  %2749 = vrcp.f32 %v1900_v57 }
 0x3e9   : > { %v2740_v31 = vpop.eup %2739  ;;  %2751 = vrcp.f32 %v1899_v26 }
 0x3ea   : > { %2010 = vperm.xlu2 %2722, %v2730_v22   ;;  %v2742_v60 = vpop.eup %2741  ;;  %2753 = vrcp.f32 %v1904_v6  ;;  %v1953_v22 = vld [vmem:[#allocation4 + $0x10] sm:$0xff]  ;;  %v1968_v6 = vld [vmem:[#allocation4 + $0x88] sm:$0xff] }
 0x3eb   : > { %2000 = vperm.xlu1 %2721, %v2732_v56   ;;  %v2744_v13 = vpop.eup %2743  ;;  %2755 = vrcp.f32 %v1903_v18  ;;  %v1951_v56 = vld [vmem:[#allocation4] sm:$0xff] }
 0x3ec   : > { %1990 = vperm.xlu0 %2720, %v2734_v58   ;;  %v2746_v53 = vpop.eup %2745  ;;  %2757 = vrcp.f32 %v1902_v55 }
 0x3ed   : > { %v2748_v34 = vpop.eup %2747  ;;  %2759 = vrcp.f32 %v1907_v54 }
 0x3ee   : > { %v2750_v15 = vpop.eup %2749  ;;  %2761 = vrcp.f32 %v1906_v63 }
 0x3ef   : > { %v2752_v2 = vpop.eup %2751  ;;  %2763 = vrcp.f32 %v1905_v8  ;;  %v1961_v8 = vld [vmem:[#allocation4 + $0x50] sm:$0xff] }
 0x3f0   : > { %v2754_v7 = vpop.eup %2753  ;;  %2765 = vrcp.f32 %v1910_v30  ;;  %v1960_v30 = vld [vmem:[#allocation4 + $0x48] sm:$0xff] }
 0x3f1   : > { %v2756_v38 = vpop.eup %2755  ;;  %2767 = vrcp.f32 %v1909_v62 }
 0x3f2   : > { %2025 = vperm.xlu2 %2722, %v2736_v16   ;;  %v2758_v33 = vpop.eup %2757  ;;  %2769 = vrcp.f32 %v1908_v35 }
 0x3f3   : > { %2020 = vperm.xlu1 %2721, %v2738_v42   ;;  %v2760_v0 = vpop.eup %2759  ;;  %2771 = vrcp.f32 %v1913_v51  ;;  %v1965_v42 = vld [vmem:[#allocation4 + $0x70] sm:$0xff]  ;;  %v1974_v51 = vld [vmem:[#allocation4 + $0xb8] sm:$0xff] }
 0x3f4   : > { %2015 = vperm.xlu0 %2720, %v2740_v31   ;;  %v2762_v39 = vpop.eup %2761  ;;  %2773 = vrcp.f32 %v1912_v4 }
 0x3f5   : > { %v2764_v10 = vpop.eup %2763  ;;  %2775 = vrcp.f32 %v1911_v46 }
 0x3f6   : > { %v2766_v11 = vpop.eup %2765  ;;  %2777 = vrcp.f32 %v1916_v1 }
 0x3f7   : > { %v2768_v28 = vpop.eup %2767  ;;  %2779 = vrcp.f32 %v1915_v40 }
 0x3f8   : > { %v2770_v24 = vpop.eup %2769  ;;  %2781 = vrcp.f32 %v1914_v17  ;;  %v1967_v17 = vld [vmem:[#allocation4 + $0x80] sm:$0xff] }
 0x3f9   : > { %v2772_v52 = vpop.eup %2771  ;;  %2783 = vrcp.f32 %v1918_v47 }
 0x3fa   : > { %2040 = vperm.xlu2 %2722, %v2742_v60   ;;  %v2774_v61 = vpop.eup %2773  ;;  %2785 = vrcp.f32 %v1917_v19 }
 0x3fb   : > { %2035 = vperm.xlu1 %2721, %v2744_v13   ;;  %v2776_v48 = vpop.eup %2775 }
 0x3fc   : > { %2030 = vperm.xlu0 %2720, %v2746_v53   ;;  %v2778_v3 = vpop.eup %2777 }
 0x3fd   : > { %v2780_v43 = vpop.eup %2779 }
 0x3fe   : > { %v2782_v21 = vpop.eup %2781 }
 0x3ff   : > { %v2784_v41 = vpop.eup %2783 }
 0x400   : > { %v2786_v29 = vpop.eup %2785 }
 0x402   : > { %2055 = vperm.xlu2 %2722, %v2748_v34   ;;  %v1958_v34 = vld [vmem:[#allocation4 + $0x38] sm:$0xff] }
 0x403   : > { %2050 = vperm.xlu1 %2721, %v2750_v15   ;;  %v1957_v15 = vld [vmem:[#allocation4 + $0x30] sm:$0xff] }
 0x404   : > { %2045 = vperm.xlu0 %2720, %v2752_v2  }
 0x40a   : > { %2070 = vperm.xlu2 %2722, %v2754_v7  }
 0x40b   : > { %2065 = vperm.xlu1 %2721, %v2756_v38   ;;  %v1971_v38 = vld [vmem:[#allocation4 + $0xa0] sm:$0xff] }
 0x40c   : > { %2060 = vperm.xlu0 %2720, %v2758_v33  }
 0x412   : > { %2085 = vperm.xlu2 %2722, %v2760_v0  }
 0x413   : > { %2080 = vperm.xlu1 %2721, %v2762_v39  }
 0x414   : > { %2075 = vperm.xlu0 %2720, %v2764_v10  }
 0x41a   : > { %2100 = vperm.xlu2 %2722, %v2766_v11   ;;  %v1964_v11 = vld [vmem:[#allocation4 + $0x68] sm:$0xff] }
 0x41b   : > { %2095 = vperm.xlu1 %2721, %v2768_v28   ;;  %v1963_v28 = vld [vmem:[#allocation4 + $0x60] sm:$0xff] }
 0x41c   : > { %2090 = vperm.xlu0 %2720, %v2770_v24  }
 0x422   : > { %2115 = vperm.xlu2 %2722, %v2772_v52  }
 0x423   : > { %2110 = vperm.xlu1 %2721, %v2774_v61   ;;  %v1977_v61 = vld [vmem:[#allocation4 + $0xd0] sm:$0xff] }
 0x424   : > { %2105 = vperm.xlu0 %2720, %v2776_v48  }
 0x42a   : > { %2130 = vperm.xlu2 %2722, %v2778_v3   ;;  %v1966_v3 = vld [vmem:[#allocation4 + $0x78] sm:$0xff] }
 0x42b   : > { %2125 = vperm.xlu1 %2721, %v2780_v43  }
 0x42c   : > { %2120 = vperm.xlu0 %2720, %v2782_v21  }
 0x433   : > { %2140 = vperm.xlu1 %2721, %v2784_v41  }
 0x434   : > { %2135 = vperm.xlu0 %2720, %v2786_v29   ;;  %v1980_v29 = vld [vmem:[#allocation4 + $0xe8] sm:$0xff] }
 0x43c   : > { %v2006_v25 = vpop.permute.xlu2 %2005 }
 0x43d   : > { %v2147_v23 = vmul.f32 %v2006_v25, %v1955_v27  ;;  %v1970_v27 = vld [vmem:[#allocation4 + $0x98] sm:$0xff] }
 0x43f   : > { %2179 = vst.msk [vmem:[%s2902_s8 + $0x20] sm:$0xff] %vm575_vm2, %v2147_v23  ;;  %v1969_v23 = vld [vmem:[#allocation4 + $0x90] sm:$0xff] }
 0x444   : > { %v2011_v49 = vpop.permute.xlu2 %2010 }
 0x445   : > { %v2148_v45 = vmul.f32 %v2011_v49, %v1956_v36 }
 0x447   : > { %2180 = vst.msk [vmem:[%s2902_s8 + $0x28] sm:$0xff] %vm575_vm2, %v2148_v45 }
 0x44c   : > { %v2026_v50 = vpop.permute.xlu2 %2025 }
 0x44d   : > { %v2151_v32 = vmul.f32 %v2026_v50, %v1959_v20 }
 0x44f   : > { %2183 = vst.msk [vmem:[%s2902_s8 + $0x40] sm:$0xff] %vm575_vm2, %v2151_v32  ;;  %v1973_v32 = vld [vmem:[#allocation4 + $0xb0] sm:$0xff] }
 0x454   : > { %v2041_v37 = vpop.permute.xlu2 %2040 }
 0x455   : > { %v2154_v14 = vmul.f32 %v2041_v37, %v1962_v44  ;;  %v1996_v58 = vpop.permute.xlu1 %1995  ;;  %v1972_v44 = vld [vmem:[#allocation4 + $0xa8] sm:$0xff] }
 0x456   : > { %v2145_v59 = vmul.f32 %v1996_v58, %v1953_v22  ;;  %v1986_v16 = vpop.permute.xlu0 %1985  ;;  %v1976_v58 = vld [vmem:[#allocation4 + $0xc8] sm:$0xff] }
 0x457   : > { %2186 = vst.msk [vmem:[%s2902_s8 + $0x58] sm:$0xff] %vm575_vm2, %v2154_v14  ;;  %v2143_v5 = vmul.f32 %v1986_v16, %v1951_v56 }
 0x458   : > { %2177 = vst.msk [vmem:[%s2902_s8 + $0x10] sm:$0xff] %vm575_vm2, %v2145_v59  ;;  %v1975_v59 = vld [vmem:[#allocation4 + $0xc0] sm:$0xff] }
 0x459   : > { %2175 = vst.msk [vmem:[%s2902_s8] sm:$0xff] %vm575_vm2, %v2143_v5 }
 0x45c   : > { %v2056_v31 = vpop.permute.xlu2 %2055 }
 0x45d   : > { %v2157_v60 = vmul.f32 %v2056_v31, %v1965_v42  ;;  %v2001_v57 = vpop.permute.xlu1 %2000  ;;  %v1979_v31 = vld [vmem:[#allocation4 + $0xe0] sm:$0xff] }
 0x45e   : > { %v2146_v13 = vmul.f32 %v2001_v57, %v1954_v9  ;;  %v1991_v26 = vpop.permute.xlu0 %1990 }
 0x45f   : > { %2189 = vst.msk [vmem:[%s2902_s8 + $0x70] sm:$0xff] %vm575_vm2, %v2157_v60  ;;  %v2144_v53 = vmul.f32 %v1991_v26, %v1952_v12  ;;  %v1978_v12 = vld [vmem:[#allocation4 + $0xd8] sm:$0xff] }
 0x460   : > { %2178 = vst.msk [vmem:[%s2902_s8 + $0x18] sm:$0xff] %vm575_vm2, %v2146_v13 }
 0x461   : > { %2176 = vst.msk [vmem:[%s2902_s8 + $0x8] sm:$0xff] %vm575_vm2, %v2144_v53  ;;  %v1982_v53 = vld [vmem:[#allocation4 + $0xf8] sm:$0xff] }
 0x464   : > { %v2071_v18 = vpop.permute.xlu2 %2070 }
 0x465   : > { %v2160_v55 = vmul.f32 %v2071_v18, %v1968_v6  ;;  %v2021_v2 = vpop.permute.xlu1 %2020  ;;  %v1981_v6 = vld [vmem:[#allocation4 + $0xf0] sm:$0xff] }
 0x466   : > { %v2150_v54 = vmul.f32 %v2021_v2, %v1958_v34  ;;  %v2016_v7 = vpop.permute.xlu0 %2015 }
 0x467   : > { %2192 = vst.msk [vmem:[%s2902_s8 + $0x88] sm:$0xff] %vm575_vm2, %v2160_v55  ;;  %v2149_v63 = vmul.f32 %v2016_v7, %v1957_v15 }
 0x468   : > { %2182 = vst.msk [vmem:[%s2902_s8 + $0x38] sm:$0xff] %vm575_vm2, %v2150_v54 }
 0x469   : > { %2181 = vst.msk [vmem:[%s2902_s8 + $0x30] sm:$0xff] %vm575_vm2, %v2149_v63 }
 0x46c   : > { %v2086_v33 = vpop.permute.xlu2 %2085 }
 0x46d   : > { %v2163_v0 = vmul.f32 %v2086_v33, %v1971_v38  ;;  %v2036_v62 = vpop.permute.xlu1 %2035 }
 0x46e   : > { %v2153_v39 = vmul.f32 %v2036_v62, %v1961_v8  ;;  %v2031_v35 = vpop.permute.xlu0 %2030 }
 0x46f   : > { %2195 = vst.msk [vmem:[%s2902_s8 + $0xa0] sm:$0xff] %vm575_vm2, %v2163_v0  ;;  %v2152_v10 = vmul.f32 %v2031_v35, %v1960_v30 }
 0x470   : > { %2185 = vst.msk [vmem:[%s2902_s8 + $0x50] sm:$0xff] %vm575_vm2, %v2153_v39 }
 0x471   : > { %2184 = vst.msk [vmem:[%s2902_s8 + $0x48] sm:$0xff] %vm575_vm2, %v2152_v10 }
 0x474   : > { %v2101_v4 = vpop.permute.xlu2 %2100 }
 0x475   : > { %v2166_v46 = vmul.f32 %v2101_v4, %v1974_v51  ;;  %v2051_v24 = vpop.permute.xlu1 %2050 }
 0x476   : > { %v2156_v1 = vmul.f32 %v2051_v24, %v1964_v11  ;;  %v2046_v52 = vpop.permute.xlu0 %2045 }
 0x477   : > { %2198 = vst.msk [vmem:[%s2902_s8 + $0xb8] sm:$0xff] %vm575_vm2, %v2166_v46  ;;  %v2155_v40 = vmul.f32 %v2046_v52, %v1963_v28 }
 0x478   : > { %2188 = vst.msk [vmem:[%s2902_s8 + $0x68] sm:$0xff] %vm575_vm2, %v2156_v1 }
 0x479   : > { %2187 = vst.msk [vmem:[%s2902_s8 + $0x60] sm:$0xff] %vm575_vm2, %v2155_v40 }
 0x47c   : > { %v2116_v48 = vpop.permute.xlu2 %2115 }
 0x47d   : > { %v2169_v47 = vmul.f32 %v2116_v48, %v1977_v61  ;;  %v2066_v43 = vpop.permute.xlu1 %2065 }
 0x47e   : > { %v2159_v19 = vmul.f32 %v2066_v43, %v1967_v17  ;;  %v2061_v21 = vpop.permute.xlu0 %2060 }
 0x47f   : > { %2201 = vst.msk [vmem:[%s2902_s8 + $0xd0] sm:$0xff] %vm575_vm2, %v2169_v47  ;;  %v2158_v41 = vmul.f32 %v2061_v21, %v1966_v3 }
 0x480   : > { %2191 = vst.msk [vmem:[%s2902_s8 + $0x80] sm:$0xff] %vm575_vm2, %v2159_v19 }
 0x481   : > { %2190 = vst.msk [vmem:[%s2902_s8 + $0x78] sm:$0xff] %vm575_vm2, %v2158_v41 }
 0x484   : > { %v2131_v25 = vpop.permute.xlu2 %2130 }
 0x485   : > { %v2172_v36 = vmul.f32 %v2131_v25, %v1980_v29  ;;  %v2081_v49 = vpop.permute.xlu1 %2080 }
 0x486   : > { %v2162_v45 = vmul.f32 %v2081_v49, %v1970_v27  ;;  %v2076_v20 = vpop.permute.xlu0 %2075 }
 0x487   : > { %2204 = vst.msk [vmem:[%s2902_s8 + $0xe8] sm:$0xff] %vm575_vm2, %v2172_v36  ;;  %v2161_v50 = vmul.f32 %v2076_v20, %v1969_v23 }
 0x488   : > { %2194 = vst.msk [vmem:[%s2902_s8 + $0x98] sm:$0xff] %vm575_vm2, %v2162_v45 }
 0x489   : > { %2193 = vst.msk [vmem:[%s2902_s8 + $0x90] sm:$0xff] %vm575_vm2, %v2161_v50 }
 0x48d   : > { %v2096_v22 = vpop.permute.xlu1 %2095 }
 0x48e   : > { %v2165_v37 = vmul.f32 %v2096_v22, %v1973_v32  ;;  %v2091_v56 = vpop.permute.xlu0 %2090 }
 0x48f   : > { %v2164_v14 = vmul.f32 %v2091_v56, %v1972_v44 }
 0x490   : > { %2197 = vst.msk [vmem:[%s2902_s8 + $0xb0] sm:$0xff] %vm575_vm2, %v2165_v37 }
 0x491   : > { %2196 = vst.msk [vmem:[%s2902_s8 + $0xa8] sm:$0xff] %vm575_vm2, %v2164_v14 }
 0x495   : > { %v2111_v16 = vpop.permute.xlu1 %2110 }
 0x496   : > { %v2168_v5 = vmul.f32 %v2111_v16, %v1976_v58  ;;  %v2106_v42 = vpop.permute.xlu0 %2105 }
 0x497   : > { %v2167_v9 = vmul.f32 %v2106_v42, %v1975_v59 }
 0x498   : > { %2200 = vst.msk [vmem:[%s2902_s8 + $0xc8] sm:$0xff] %vm575_vm2, %v2168_v5 }
 0x499   : > { %2199 = vst.msk [vmem:[%s2902_s8 + $0xc0] sm:$0xff] %vm575_vm2, %v2167_v9 }
 0x49d   : > { %v2126_v60 = vpop.permute.xlu1 %2125 }
 0x49e   : > { %v2171_v57 = vmul.f32 %v2126_v60, %v1979_v31  ;;  %v2121_v13 = vpop.permute.xlu0 %2120 }
 0x49f   : > { %v2170_v26 = vmul.f32 %v2121_v13, %v1978_v12 }
 0x4a0   : > { %2203 = vst.msk [vmem:[%s2902_s8 + $0xe0] sm:$0xff] %vm575_vm2, %v2171_v57 }
 0x4a1   : > { %2202 = vst.msk [vmem:[%s2902_s8 + $0xd8] sm:$0xff] %vm575_vm2, %v2170_v26 }
 0x4a5   : > { %v2141_v34 = vpop.permute.xlu1 %2140 }
 0x4a6   : > { %v2174_v18 = vmul.f32 %v2141_v34, %v1982_v53  ;;  %v2136_v15 = vpop.permute.xlu0 %2135 }
 0x4a7   : > { %v2173_v55 = vmul.f32 %v2136_v15, %v1981_v6 }
 0x4a8   : > { %2206 = vst.msk [vmem:[%s2902_s8 + $0xf8] sm:$0xff] %vm575_vm2, %v2174_v18 }
 0x4a9   : > { %2205 = vst.msk [vmem:[%s2902_s8 + $0xf0] sm:$0xff] %vm575_vm2, %v2173_v55 }
 0x4aa PF: > { %s13_s16 = sadd.s32 1, %s2825_s16   ;;  %s4186_s12 = smov %s2817_s14 }
 0x4ab   : > { %p10_p9 = scmp.ge.s32.totalorder %s13_s16, 10   ;;  %s4187_s13 = smov %s2821_s15 }
 0x4ac   : > { %s4188_s14 = smov %s4191_s17  ;;  %s4189_s15 = smov %s4195_s18 }
 0x4ad   :  { %12 = sbr.rel (!%p10_p9) target bundleno = 3 (0x3), region = 76 }

</bundles_post_ra>
